<compile_context>
chip_gen: v6e
topology: v6e:2x2x1
jax: 0.10.0
libtpu: 0.0.40
codegen_flags: <defaults>
</compile_context>

<pallas_src>
import functools

import jax
import jax.numpy as jnp
import numpy as np
from jax.experimental import pallas as pl
from jax.experimental.pallas import tpu as pltpu

# ----------------------------- configuration -------------------------------
B = 2          # batch
N = 8          # sequence length
C = 32         # embedding dim
NUM_HEADS = 8
DH = C // NUM_HEADS


# ------------------------------- kernel ------------------------------------
def _attention_kernel(x_ref, wqkv_ref, bqkv_ref, wproj_ref, bproj_ref,
                      out_ref, attn_ref, *, batch, num_heads, seq, head_dim):
    b, h, n, dh = batch, num_heads, seq, head_dim
    c = h * dh
    bn = b * n
    g = b * h
    scale = dh ** (-0.5)

    # Tokens as one lane-dense (B*N, C) slab (leading-dim merge only).
    x2d = x_ref[...].reshape(bn, c)

    # One lane-dense MXU pass: (B*N, C) @ (C, 3C) + bias.
    qkv = jnp.dot(x2d, wqkv_ref[...],
                  preferred_element_type=jnp.float32) + bqkv_ref[...]   # (BN, 3C)

    def heads_major(t2d):
        # (BN, C) -> (G = B*H, N, Dh): split lanes per head, swap (N, H).
        # Small shuffle; XLU slots are otherwise idle in this kernel.
        return t2d.reshape(b, n, h, dh).transpose(0, 2, 1, 3).reshape(g, n, dh)

    q = heads_major(qkv[:, 0:c] * scale)          # scale folded as one vmul
    k = heads_major(qkv[:, c:2 * c])
    v = heads_major(qkv[:, 2 * c:3 * c])

    # Scores for all (batch, head) pairs at once.
    scores = jnp.einsum('gnd,gmd->gnm', q, k,
                        preferred_element_type=jnp.float32)             # (G, N, N)

    # Pre-softmax attention output (leading-dim split is free).
    attn_ref[...] = scores.reshape(b, h, n, n)

    # Numerically stable softmax.  Exact division: the approx EUP reciprocal
    # previously violated the 1e-3 output tolerance and buys nothing here.
    m = jnp.max(scores, axis=-1, keepdims=True)
    p = jnp.exp(scores - m)
    p = p / jnp.sum(p, axis=-1, keepdims=True)

    # attn @ v, batched over (batch, head).
    ctx = jnp.einsum('gnm,gmd->gnd', p, v,
                     preferred_element_type=jnp.float32)                # (G, N, Dh)

    # Merge heads back into the lane dimension, then one lane-dense projection
    # matmul (B*N, C) @ (C, C) + bias.
    ctx2d = ctx.reshape(b, h, n, dh).transpose(0, 2, 1, 3).reshape(bn, c)
    out = jnp.dot(ctx2d, wproj_ref[...],
                  preferred_element_type=jnp.float32) + bproj_ref[...]  # (BN, C)
    out_ref[...] = out.reshape(b, n, c).astype(out_ref.dtype)


# ------------------------------- wrapper ------------------------------------
@functools.partial(jax.jit, static_argnames=("num_heads",))
def attention_forward(x, w_qkv_t, b_qkv, w_proj_t, b_proj, num_heads=NUM_HEADS):
    b, n, c = x.shape
    h = num_heads
    dh = c // h

    # Only host-side plumbing: biases as 2-D rows (free reshapes).
    b_qkv2 = b_qkv.reshape(1, 3 * c)
    b_proj2 = b_proj.reshape(1, c)

    kernel = functools.partial(
        _attention_kernel, batch=b, num_heads=h, seq=n, head_dim=dh)

    out_shapes = (
        jax.ShapeDtypeStruct((b, n, c), jnp.float32),        # proj(x)
        jax.ShapeDtypeStruct((b, h, n, n), jnp.float32),     # attn (pre-softmax)
    )

    grid_spec = pltpu.PrefetchScalarGridSpec(
        num_scalar_prefetch=0,
        grid=(1,),                                           # single invocation
        in_specs=[
            pl.BlockSpec((b, n, c), lambda i: (0, 0, 0)),          # x
            pl.BlockSpec((c, 3 * c), lambda i: (0, 0)),            # W_qkv (dense)
            pl.BlockSpec((1, 3 * c), lambda i: (0, 0)),            # b_qkv
            pl.BlockSpec((c, c), lambda i: (0, 0)),                # W_proj (dense)
            pl.BlockSpec((1, c), lambda i: (0, 0)),                # b_proj
        ],
        out_specs=[
            pl.BlockSpec((b, n, c), lambda i: (0, 0, 0)),
            pl.BlockSpec((b, h, n, n), lambda i: (0, 0, 0, 0)),
        ],
    )

    # Advisory cost estimate (kernel is tiny / overhead-bound).
    flops = (2 * b * n * c * (3 * c)          # qkv projection
             + 2 * b * h * n * n * dh * 2     # scores + attn@v
             + 2 * b * n * c * c)             # output projection
    bytes_accessed = 4 * (b * n * c            # x
                          + c * 3 * c + 3 * c  # W_qkv, b_qkv
                          + c * c + c          # W_proj, b_proj
                          + b * n * c          # out
                          + b * h * n * n)     # attn
    cost = pl.CostEstimate(flops=flops,
                           transcendentals=b * h * n * n,
                           bytes_accessed=bytes_accessed)

    return pl.pallas_call(
        kernel,
        out_shape=out_shapes,
        grid_spec=grid_spec,
        cost_estimate=cost,
        compiler_params=pltpu.CompilerParams(
            dimension_semantics=("arbitrary",)),
    )(x, w_qkv_t, b_qkv2, w_proj_t, b_proj2)


# --------------------------- pure-JAX reference ------------------------------
def attention_reference(x, w_qkv_t, b_qkv, w_proj_t, b_proj, num_heads=NUM_HEADS):
    b, n, c = x.shape
    dh = c // num_heads
    scale = dh ** (-0.5)
    pr = jax.lax.Precision.HIGHEST
    qkv = jnp.einsum("bnc,cd->bnd", x, w_qkv_t, precision=pr) + b_qkv     # (B, N, 3C)
    qkv = qkv.reshape(b, n, 3, num_heads, dh).transpose(2, 0, 3, 1, 4)
    q, k, v = qkv[0], qkv[1], qkv[2]                                      # (B, H, N, Dh)
    attn = jnp.einsum("bhnd,bhmd->bhnm", q * scale, k, precision=pr)
    attn_sm = jax.nn.softmax(attn, axis=-1)
    o = jnp.einsum("bhnm,bhmd->bhnd", attn_sm, v, precision=pr)
    o = o.transpose(0, 2, 1, 3).reshape(b, n, c)
    o = jnp.einsum("bnc,cd->bnd", o, w_proj_t, precision=pr) + b_proj
    return o, attn


# --------------------------------- main --------------------------------------
if __name__ == "__main__":
    key = jax.random.PRNGKey(0)
    kx, kw1, kw2, kb2 = jax.random.split(key, 4)

    x = jax.random.normal(kx, (B, N, C), dtype=jnp.float32)

    # torch Linear weights are (out, in); store transposed (in, out).
    # qkv_bias=False in the default module -> zero qkv bias.
    w_qkv_t = (jax.random.normal(kw1, (C, 3 * C), dtype=jnp.float32)
               * (1.0 / np.sqrt(C)))
    b_qkv = jnp.zeros((3 * C,), dtype=jnp.float32)
    w_proj_t = (jax.random.normal(kw2, (C, C), dtype=jnp.float32)
                * (1.0 / np.sqrt(C)))
    b_proj = jax.random.normal(kb2, (C,), dtype=jnp.float32) * 0.02

    out, attn_wo_softmax = attention_forward(
        x, w_qkv_t, b_qkv, w_proj_t, b_proj, num_heads=NUM_HEADS)
    jax.block_until_ready((out, attn_wo_softmax))

    ref_out, ref_attn = attention_reference(
        x, w_qkv_t, b_qkv, w_proj_t, b_proj, num_heads=NUM_HEADS)

    np.testing.assert_allclose(np.asarray(attn_wo_softmax), np.asarray(ref_attn),
                               rtol=1e-3, atol=1e-3)
    np.testing.assert_allclose(np.asarray(out), np.asarray(ref_out),
                               rtol=1e-3, atol=1e-3)

    print("KERNEL_OK")
</pallas_src>

<mosaic_0001>
module attributes {stable_mosaic.version = 11 : i64} {
  func.func @_attention_kernel(%arg0: i32, %arg1: memref<2x8x32xf32, #tpu.memory_space<vmem>>, %arg2: memref<32x96xf32, #tpu.memory_space<vmem>>, %arg3: memref<1x96xf32, #tpu.memory_space<vmem>>, %arg4: memref<32x32xf32, #tpu.memory_space<vmem>>, %arg5: memref<1x32xf32, #tpu.memory_space<vmem>>, %arg6: memref<2x8x32xf32, #tpu.memory_space<vmem>>, %arg7: memref<2x8x8x8xf32, #tpu.memory_space<vmem>>) attributes {dimension_semantics = [#tpu.dimension_semantics<arbitrary>], iteration_bounds = array<i64: 1>, scalar_prefetch = 0 : i64, scratch_operands = 0 : i64, tpu.core_type = #tpu.core_type<tc>, window_params = [{pipeline_mode = #tpu.pipeline_mode<synchronous>, transform_indices = @transform_0, window_bounds = array<i64: 2, 8, 32>}, {pipeline_mode = #tpu.pipeline_mode<synchronous>, transform_indices = @transform_1, window_bounds = array<i64: 32, 96>}, {pipeline_mode = #tpu.pipeline_mode<synchronous>, transform_indices = @transform_2, window_bounds = array<i64: 1, 96>}, {pipeline_mode = #tpu.pipeline_mode<synchronous>, transform_indices = @transform_3, window_bounds = array<i64: 32, 32>}, {pipeline_mode = #tpu.pipeline_mode<synchronous>, transform_indices = @transform_4, window_bounds = array<i64: 1, 32>}, {pipeline_mode = #tpu.pipeline_mode<synchronous>, transform_indices = @transform_5, window_bounds = array<i64: 2, 8, 32>}, {pipeline_mode = #tpu.pipeline_mode<synchronous>, transform_indices = @transform_6, window_bounds = array<i64: 2, 8, 8, 8>}]} {
    %c0 = arith.constant 0 : index
    %c0_0 = arith.constant 0 : index
    %c0_1 = arith.constant 0 : index
    %0 = vector.load %arg1[%c0, %c0_0, %c0_1] : memref<2x8x32xf32, #tpu.memory_space<vmem>>, vector<2x8x32xf32>
    %1 = vector.shape_cast %0 : vector<2x8x32xf32> to vector<16x32xf32>
    %c0_2 = arith.constant 0 : index
    %c0_3 = arith.constant 0 : index
    %2 = vector.load %arg2[%c0_2, %c0_3] : memref<32x96xf32, #tpu.memory_space<vmem>>, vector<32x96xf32>
    %cst = arith.constant dense<0.000000e+00> : vector<16x96xf32>
    %3 = tpu.matmul %1, %2, %cst {dimension_numbers = #tpu.dot_dimension_numbers<[1], [0], [0], [1], [0, 0, 1, 1], [], []>} : vector<16x32xf32>, vector<32x96xf32>, vector<16x96xf32> -> vector<16x96xf32>
    %c0_4 = arith.constant 0 : index
    %c0_5 = arith.constant 0 : index
    %4 = vector.load %arg3[%c0_4, %c0_5] : memref<1x96xf32, #tpu.memory_space<vmem>>, vector<1x96xf32>
    %5 = vector.broadcast %4 : vector<1x96xf32> to vector<16x96xf32>
    %6 = arith.addf %3, %5 : vector<16x96xf32>
    %7 = vector.extract_strided_slice %6 {offsets = [0, 0], sizes = [16, 32], strides = [1, 1]} : vector<16x96xf32> to vector<16x32xf32>
    %cst_6 = arith.constant 5.000000e-01 : f32
    %8 = vector.broadcast %cst_6 : f32 to vector<16x32xf32>
    %9 = arith.mulf %7, %8 : vector<16x32xf32>
    %10 = vector.shape_cast %9 : vector<16x32xf32> to vector<2x8x8x4xf32>
    %11 = tpu.transpose %10, [0, 2, 1, 3] : vector<2x8x8x4xf32> -> vector<2x8x8x4xf32>
    %12 = vector.shape_cast %11 : vector<2x8x8x4xf32> to vector<16x8x4xf32>
    %13 = vector.extract_strided_slice %6 {offsets = [0, 32], sizes = [16, 32], strides = [1, 1]} : vector<16x96xf32> to vector<16x32xf32>
    %14 = vector.shape_cast %13 : vector<16x32xf32> to vector<2x8x8x4xf32>
    %15 = tpu.transpose %14, [0, 2, 1, 3] : vector<2x8x8x4xf32> -> vector<2x8x8x4xf32>
    %16 = vector.shape_cast %15 : vector<2x8x8x4xf32> to vector<16x8x4xf32>
    %17 = vector.extract_strided_slice %6 {offsets = [0, 64], sizes = [16, 32], strides = [1, 1]} : vector<16x96xf32> to vector<16x32xf32>
    %18 = vector.shape_cast %17 : vector<16x32xf32> to vector<2x8x8x4xf32>
    %19 = tpu.transpose %18, [0, 2, 1, 3] : vector<2x8x8x4xf32> -> vector<2x8x8x4xf32>
    %20 = vector.shape_cast %19 : vector<2x8x8x4xf32> to vector<16x8x4xf32>
    "tpu.trace_start"() <{level = 10 : i32, message = "gnd,gmd->gnm"}> : () -> ()
    %cst_7 = arith.constant dense<0.000000e+00> : vector<16x8x8xf32>
    %21 = tpu.matmul %12, %16, %cst_7 {dimension_numbers = #tpu.dot_dimension_numbers<[2], [2], [1], [1], [0, 0, 0, 1, 1, 1], [0], [0]>} : vector<16x8x4xf32>, vector<16x8x4xf32>, vector<16x8x8xf32> -> vector<16x8x8xf32>
    "tpu.trace_stop"() : () -> ()
    %22 = vector.shape_cast %21 : vector<16x8x8xf32> to vector<2x8x8x8xf32>
    %c0_8 = arith.constant 0 : index
    %c0_9 = arith.constant 0 : index
    %c0_10 = arith.constant 0 : index
    %c0_11 = arith.constant 0 : index
    %23 = vector.load %arg7[%c0_8, %c0_9, %c0_10, %c0_11] : memref<2x8x8x8xf32, #tpu.memory_space<vmem>>, vector<2x8x8x8xf32>
    tpu.vector_store %arg7[%c0_8, %c0_9, %c0_10, %c0_11], %22 {strides = array<i32>} : memref<2x8x8x8xf32, #tpu.memory_space<vmem>>, vector<2x8x8x8xf32>,
    %cst_12 = arith.constant dense<0xFF800000> : vector<16x8xf32>
    %24 = vector.multi_reduction <maximumf>, %21, %cst_12 [2] : vector<16x8x8xf32> to vector<16x8xf32>
    %25 = vector.shape_cast %24 : vector<16x8xf32> to vector<16x8x1xf32>
    %26 = vector.broadcast %25 : vector<16x8x1xf32> to vector<16x8x8xf32>
    %27 = arith.subf %21, %26 : vector<16x8x8xf32>
    %28 = math.exp %27 : vector<16x8x8xf32>
    %cst_13 = arith.constant dense<0.000000e+00> : vector<16x8xf32>
    %29 = vector.multi_reduction <add>, %28, %cst_13 [2] : vector<16x8x8xf32> to vector<16x8xf32>
    %30 = vector.shape_cast %29 : vector<16x8xf32> to vector<16x8x1xf32>
    %31 = vector.broadcast %30 : vector<16x8x1xf32> to vector<16x8x8xf32>
    %32 = arith.divf %28, %31 : vector<16x8x8xf32>
    "tpu.trace_start"() <{level = 10 : i32, message = "gnm,gmd->gnd"}> : () -> ()
    %cst_14 = arith.constant dense<0.000000e+00> : vector<16x8x4xf32>
    %33 = tpu.matmul %32, %20, %cst_14 {dimension_numbers = #tpu.dot_dimension_numbers<[2], [1], [1], [2], [0, 0, 0, 1, 1, 2], [0], [0]>} : vector<16x8x8xf32>, vector<16x8x4xf32>, vector<16x8x4xf32> -> vector<16x8x4xf32>
    "tpu.trace_stop"() : () -> ()
    %34 = vector.shape_cast %33 : vector<16x8x4xf32> to vector<2x8x8x4xf32>
    %35 = tpu.transpose %34, [0, 2, 1, 3] : vector<2x8x8x4xf32> -> vector<2x8x8x4xf32>
    %36 = vector.shape_cast %35 : vector<2x8x8x4xf32> to vector<16x32xf32>
    %c0_15 = arith.constant 0 : index
    %c0_16 = arith.constant 0 : index
    %37 = vector.load %arg4[%c0_15, %c0_16] : memref<32x32xf32, #tpu.memory_space<vmem>>, vector<32x32xf32>
    %cst_17 = arith.constant dense<0.000000e+00> : vector<16x32xf32>
    %38 = tpu.matmul %36, %37, %cst_17 {dimension_numbers = #tpu.dot_dimension_numbers<[1], [0], [0], [1], [0, 0, 1, 1], [], []>} : vector<16x32xf32>, vector<32x32xf32>, vector<16x32xf32> -> vector<16x32xf32>
    %c0_18 = arith.constant 0 : index
    %c0_19 = arith.constant 0 : index
    %39 = vector.load %arg5[%c0_18, %c0_19] : memref<1x32xf32, #tpu.memory_space<vmem>>, vector<1x32xf32>
    %40 = vector.broadcast %39 : vector<1x32xf32> to vector<16x32xf32>
    %41 = arith.addf %38, %40 : vector<16x32xf32>
    %42 = vector.shape_cast %41 : vector<16x32xf32> to vector<2x8x32xf32>
    %c0_20 = arith.constant 0 : index
    %c0_21 = arith.constant 0 : index
    %c0_22 = arith.constant 0 : index
    %43 = vector.load %arg6[%c0_20, %c0_21, %c0_22] : memref<2x8x32xf32, #tpu.memory_space<vmem>>, vector<2x8x32xf32>
    tpu.vector_store %arg6[%c0_20, %c0_21, %c0_22], %42 {strides = array<i32>} : memref<2x8x32xf32, #tpu.memory_space<vmem>>, vector<2x8x32xf32>,
    return
  }
  func.func @transform_0(%arg0: i32) -> (i32, i32, i32) {
    %c0_i32 = arith.constant 0 : i32
    %c0_i32_0 = arith.constant 0 : i32
    %c0_i32_1 = arith.constant 0 : i32
    %c0_i32_2 = arith.constant 0 : i32
    return %c0_i32, %c0_i32_0, %c0_i32_1 : i32, i32, i32
  }
  func.func @transform_1(%arg0: i32) -> (i32, i32) {
    %c0_i32 = arith.constant 0 : i32
    %c0_i32_0 = arith.constant 0 : i32
    %c0_i32_1 = arith.constant 0 : i32
    return %c0_i32, %c0_i32_0 : i32, i32
  }
  func.func @transform_2(%arg0: i32) -> (i32, i32) {
    %c0_i32 = arith.constant 0 : i32
    %c0_i32_0 = arith.constant 0 : i32
    %c0_i32_1 = arith.constant 0 : i32
    return %c0_i32, %c0_i32_0 : i32, i32
  }
  func.func @transform_3(%arg0: i32) -> (i32, i32) {
    %c0_i32 = arith.constant 0 : i32
    %c0_i32_0 = arith.constant 0 : i32
    %c0_i32_1 = arith.constant 0 : i32
    return %c0_i32, %c0_i32_0 : i32, i32
  }
  func.func @transform_4(%arg0: i32) -> (i32, i32) {
    %c0_i32 = arith.constant 0 : i32
    %c0_i32_0 = arith.constant 0 : i32
    %c0_i32_1 = arith.constant 0 : i32
    return %c0_i32, %c0_i32_0 : i32, i32
  }
  func.func @transform_5(%arg0: i32) -> (i32, i32, i32) {
    %c0_i32 = arith.constant 0 : i32
    %c0_i32_0 = arith.constant 0 : i32
    %c0_i32_1 = arith.constant 0 : i32
    %c0_i32_2 = arith.constant 0 : i32
    return %c0_i32, %c0_i32_0, %c0_i32_1 : i32, i32, i32
  }
  func.func @transform_6(%arg0: i32) -> (i32, i32, i32, i32) {
    %c0_i32 = arith.constant 0 : i32
    %c0_i32_0 = arith.constant 0 : i32
    %c0_i32_1 = arith.constant 0 : i32
    %c0_i32_2 = arith.constant 0 : i32
    %c0_i32_3 = arith.constant 0 : i32
    return %c0_i32, %c0_i32_0, %c0_i32_1, %c0_i32_2 : i32, i32, i32, i32
  }
}

</mosaic_0001>

<bundles_post_ra>
// kernel: attention_forward.1
= control target key start
LH: loop header
LB: loop body
LE: loop exit
PB: predicated region body
PF: predicated region fallthrough
CT: control target
= control target key end

     0   :  { %12 = vsyncpa [#allocation3], 0  ;;  %s7006_s0 = inlined_call_operand.hbm [shape: f32[2,8,32], index: 0, kind: input, shape index: {}]   ;;  %s7007_s1 = inlined_call_operand.hbm [shape: f32[32,96], index: 1, kind: input, shape index: {}]   ;;  %s7008_s2 = inlined_call_operand.vmem [shape: f32[1,96], index: 2, kind: input, shape index: {}]   ;;  %s7009_s3 = inlined_call_operand.hbm [shape: f32[32,32], index: 3, kind: input, shape index: {}]   ;;  %s7010_s4 = inlined_call_operand.vmem [shape: f32[1,32], index: 4, kind: input, shape index: {}]   ;;  %s7011_s5 = inlined_call_operand.hbm [shape: f32[2,8,32], index: 5, kind: output, shape index: {0}]   ;;  %s7012_s6 = inlined_call_operand.hbm [shape: f32[2,8,8,8], index: 6, kind: output, shape index: {1}]  }
   0x1   :  { %13 = vsyncpa [#allocation6], 0 }
   0x2   :  { %14 = vsyncpa [#allocation4], 0 }
   0x3   :  { %15 = vsyncpa [#allocation10], 0  ;;  %s5863_s21 = smov [#allocation5]   ;;  %s5864_s23 = smov [#allocation2]  }
   0x4   :  { %s33_s22 = sshll.u32 %s5863_s21, 4  ;;  %s21_s24 = sshll.u32 %s5864_s23, 4  ;;  %s34_s22 = int_to_ptr.vmem [resolvable:$true] %s33_s22  ;;  %s22_s24 = int_to_ptr.vmem [resolvable:$true] %s21_s24 }
   0x5   :  { %s5763_s25 = scalar_lea.vmem %s34_s22, 512  ;;  %p5768_p1 = scmp.lt.s32.totalorder %s34_s22, %s34_s22 }
   0x6   :  { %p5764_p0 = scmp.ne.s32.totalorder %s34_s22, %s5763_s25  ;;  %p5769_p2 = scmp.lt.s32.totalorder %s5763_s25, %s5763_s25 }
   0x8   :  { %p5770_p3 = por %p5769_p2, %p5768_p1 }
   0xa   :  { %p5771_p4 = pnand %p5770_p3, %p5764_p0 }
   0xc   :  { %5774 = shalt.err (!%p5771_p4)
}
   0xd   :  { %s5865_s26 = smov 128   ;;  %s5866_s27 = smov 8  }
   0xe   :  { %39 = dma.hbm_to_vmem [thread:$0]  %s7007_s1, 512, %s34_s22, [#allocation6], %s5865_s26, %s5865_s26, %s5866_s27  }
   0xf   :  { %s5783_s30 = scalar_lea.vmem %s22_s24, 256  ;;  %p5788_p6 = scmp.lt.s32.totalorder %s22_s24, %s22_s24 }
  0x10   :  { %p5784_p5 = scmp.ne.s32.totalorder %s22_s24, %s5783_s30  ;;  %p5789_p7 = scmp.lt.s32.totalorder %s5783_s30, %s5783_s30 }
  0x12   :  { %p5790_p8 = por %p5789_p7, %p5788_p6 }
  0x14   :  { %p5791_p9 = pnand %p5790_p8, %p5784_p5 }
  0x16   :  { %5794 = shalt.err (!%p5791_p9)
}
  0x17   :  { %27 = dma.hbm_to_vmem [thread:$0]  %s7006_s0, 256, %s22_s24, [#allocation3], %s5865_s26, %s5865_s26, %s5866_s27  }
  0x18   :  { %s5867_s9 = smov [#allocation7]  }
  0x19   :  { %s47_s10 = sshll.u32 %s5867_s9, 4  ;;  %s48_s10 = int_to_ptr.vmem [resolvable:$true] %s47_s10 }
  0x1a   :  { %s5803_s11 = scalar_lea.vmem %s48_s10, 512  ;;  %p5808_p11 = scmp.lt.s32.totalorder %s48_s10, %s48_s10 }
  0x1b   :  { %p5804_p10 = scmp.ne.s32.totalorder %s48_s10, %s5803_s11  ;;  %p5809_p12 = scmp.lt.s32.totalorder %s5803_s11, %s5803_s11 }
  0x1d   :  { %p5810_p13 = por %p5809_p12, %p5808_p11 }
  0x1f   :  { %p5811_p0 = pnand %p5810_p13, %p5804_p10 }
  0x21   :  { %5814 = shalt.err (!%p5811_p0)
}
  0x22   :  { %53 = dma.hbm_to_vmem [thread:$0]  %s7009_s3, 512, %s48_s10, [#allocation6], %s5865_s26, %s5865_s26, %s5866_s27  }
  0x23   :  { %5855 = dma.done.wait [#allocation3], 256  }
  0x24   :  { %5856 = vsyncadd [#allocation3], 4294967040 }
  0x25   :  { %5857 = dma.done.wait [#allocation6], 1024  }
  0x26   :  { %5858 = vsyncadd [#allocation6], 4294966272  ;;  %vm78_vm0 = vcmask 261120   ;;  %v70_v0 = vld [vmem:[#allocation5 + $0x18] sm:$0xff]  ;;  %v69_v1 = vld [vmem:[#allocation5 + $0x10] sm:$0xff]  ;;  %s5868_s13 = smov 116   ;;  %v211_v34 = vlaneseq }
  0x27   :  { %5483 = vmatprep.subr.mxu0 %v70_v0  ;;  %v65_v2 = vld [vmem:[#allocation2] sm:$0xff]  ;;  %v68_v3 = vld [vmem:[#allocation5 + $0x8] sm:$0xff]  ;;  %v67_v4 = vld [vmem:[#allocation5] sm:$0xff]  ;;  %s5869_s14 = smov 124   ;;  %s5870_s15 = smov 112   ;;  %v5876_v18 = vmov 0.0  }
  0x28   :  { %5484 = vmatpush3.msra.mxu0 %v70_v0  ;;  %5491 = vmatprep.mubr.msk.f32.mxu0 %vm78_vm0, %v65_v2  ;;  %v66_v5 = vld [vmem:[#allocation2 + $0x8] sm:$0xff]  ;;  %v5289_v7 = vld [vmem:[%s7008_s2] ss:$0 sm:$0xff]  ;;  %s5871_s16 = smov 120   ;;  %s5872_s2 = smov 104   ;;  %vm5877_vm1 = vmmov 0  }
  0x29   :  { %5485 = vmatprep.subr.mxu0 %v69_v1  ;;  %s5873_s17 = smov 108   ;;  %s5874_s18 = smov 100   ;;  %5494 = vmatprep.subr.mxu1 %v5876_v18  ;;  %v5879_v32 = vmov 1983009808   ;;  %v212_v37 = vshrl.u32 %v211_v34, 7  ;;  %vm1964_vm2 = vcmask 31744  }
  0x2a   :  { %5486 = vmatpush3.msra.mxu0 %v69_v1  ;;  %s5875_s19 = smov 96   ;;  %5496 = vmatprep.mubr.msk.f32.mxu1 %vm5877_vm1, %v5876_v18  ;;  %s5878_s20 = smov 64   ;;  %v209_v33 = vunpack.c.l.s4 %v5879_v32  ;;  %v5880_v40 = vmov 1934713408   ;;  %vm3181_vm3 = vcmask 64512   ;;  %vm5146_vm4 = vcmask 97280  }
  0x2b   :  { %5487 = vmatprep.subr.mxu0 %v68_v3  ;;  %v273_v41 = vunpack.c.l.s4 %v5880_v40  ;;  %s5881_s21 = smov 4   ;;  %s5882_s22 = smov 12   ;;  %vm5149_vm5 = vcmask 130048   ;;  %vm5152_vm6 = vcmask 162816   ;;  %vm5155_vm7 = vcmask 195584  }
  0x2c   :  { %5488 = vmatpush3.msra.mxu0 %v68_v3  ;;  %v210_v36 = vunpack.c.0.s8 %v209_v33  ;;  %s5883_s23 = smov 16   ;;  %s5884_s24 = smov 20   ;;  %vm5158_vm8 = vcmask 228352  }
  0x2d   :  { %5489 = vmatprep.subr.mxu0 %v67_v4  ;;  %v274_v47 = vunpack.c.0.s8 %v273_v41  ;;  %s5885_s25 = smov 24   ;;  %s5886_s28 = smov 28  }
  0x2e   :  { %5490 = vmatpush3.msra.mxu0 %v67_v4  ;;  %v6067_v44 = vsub.s32 %v210_v36, %v212_v37  ;;  %s5887_s29 = smov [#allocation9]  }
  0x2f   :  { %5492 = vmatmul.mubr.msk.f32.vlgmr.msra.gmra.mxu0 %vm78_vm0, %v66_v5  ;;  %5514 = vmatprep.subr.mxu0 %v5876_v18  ;;  %v6075_v56 = vsub.s32 %v274_v47, %v212_v37  ;;  %s5272_s30 = sshll.u32 %s5887_s29, 4  ;;  %s5273_s30 = int_to_ptr.vmem [resolvable:$true] %s5272_s30 }
  0x30   :  { %5516 = vmatprep.mubr.msk.f32.mxu0 %vm5877_vm1, %v5876_v18  ;;  %s5815_s7 = scalar_lea.vmem %s5273_s30, 2048  ;;  %p5820_p2 = scmp.lt.s32.totalorder %s5273_s30, %s5273_s30 }
  0x31   :  { %p5816_p1 = scmp.ne.s32.totalorder %s5273_s30, %s5815_s7  ;;  %p5821_p3 = scmp.lt.s32.totalorder %s5815_s7, %s5815_s7 }
  0x33   :  { %p5822_p4 = por %p5821_p3, %p5820_p2 }
  0x35   :  { %p5823_p5 = pnand %p5822_p4, %p5816_p1 }
  0xef   :  { %v5493_v6 = vpop.f32.mrf.mxu0 }
  0xf0   :  { %v5961_v10 = vadd.f32 %v5493_v6, %v5289_v7 }
  0xf1   :  { %v151_v8 = vpop.f32.mrf.mxu0 }
  0xf2   :  { %v5947_v9 = vadd.f32 %v5289_v7, %v151_v8  ;;  %v6013_v23 = vmul.f32 0.5, %v5961_v10 }
  0xf4   :  { %760 = vrot.lane.b32.xlu1 %v5947_v9, %s5868_s13  ;;  %752 = vrot.lane.b32.xlu0 %v5947_v9, %s5869_s14  ;;  %v5984_v11 = vmul.f32 0.5, %v5947_v9 }
  0xf8   :  { %764 = vrot.lane.b32.xlu1 %v5947_v9, %s5870_s15  ;;  %756 = vrot.lane.b32.xlu0 %v5947_v9, %s5871_s16 }
  0xfc   :  { %772 = vrot.lane.b32.xlu1 %v5947_v9, %s5872_s2  ;;  %768 = vrot.lane.b32.xlu0 %v5947_v9, %s5873_s17 }
 0x100   :  { %754 = vrot.lane.b32.xlu1 %v5961_v10, %s5869_s14  ;;  %776 = vrot.lane.b32.xlu0 %v5947_v9, %s5874_s18 }
 0x104   :  { %762 = vrot.lane.b32.xlu1 %v5961_v10, %s5868_s13  ;;  %758 = vrot.lane.b32.xlu0 %v5961_v10, %s5871_s16 }
 0x108   :  { %770 = vrot.lane.b32.xlu1 %v5961_v10, %s5873_s17  ;;  %766 = vrot.lane.b32.xlu0 %v5961_v10, %s5870_s15 }
 0x10c   :  { %778 = vrot.lane.b32.xlu1 %v5961_v10, %s5874_s18  ;;  %774 = vrot.lane.b32.xlu0 %v5961_v10, %s5872_s2 }
 0x110   :  { %782 = vrot.lane.b32.xlu1 %v5961_v10, %s5875_s19  ;;  %780 = vrot.lane.b32.xlu0 %v5947_v9, %s5875_s19 }
 0x114   :  { %170 = vrot.lane.b32.xlu1 %v5984_v11, %s5871_s16  ;;  %164 = vrot.lane.b32.xlu0 %v5984_v11, %s5869_s14 }
 0x118   :  { %182 = vrot.lane.b32.xlu1 %v5984_v11, %s5870_s15  ;;  %176 = vrot.lane.b32.xlu0 %v5984_v11, %s5868_s13 }
 0x11c   :  { %194 = vrot.lane.b32.xlu1 %v5984_v11, %s5872_s2  ;;  %188 = vrot.lane.b32.xlu0 %v5984_v11, %s5873_s17 }
 0x120   :  { %200 = vrot.lane.b32.xlu0 %v5984_v11, %s5874_s18 }
 0x166   :  { %v761_v12 = vpop.permute.xlu1 %760  ;;  %v753_v13 = vpop.permute.xlu0 %752 }
 0x167   :  { %784 = vrot.lane.b32.xlu1 %v753_v13, %s5875_s19 }
 0x16a   :  { %v765_v14 = vpop.permute.xlu1 %764  ;;  %v757_v15 = vpop.permute.xlu0 %756 }
 0x16b   :  { %792 = vrot.lane.b32.xlu1 %v761_v12, %s5875_s19  ;;  %788 = vrot.lane.b32.xlu0 %v757_v15, %s5875_s19 }
 0x16e   :  { %v773_v16 = vpop.permute.xlu1 %772  ;;  %v769_v17 = vpop.permute.xlu0 %768 }
 0x172   :  { %v755_v19 = vpop.permute.xlu1 %754  ;;  %v777_v20 = vpop.permute.xlu0 %776 }
 0x173   :  { %786 = vrot.lane.b32.xlu0 %v755_v19, %s5875_s19 }
 0x176   :  { %v763_v21 = vpop.permute.xlu1 %762  ;;  %v759_v22 = vpop.permute.xlu0 %758 }
 0x177   :  { %790 = vrot.lane.b32.xlu1 %v759_v22, %s5875_s19  ;;  %794 = vrot.lane.b32.xlu0 %v763_v21, %s5875_s19 }
 0x17a   :  { %v6023_v24 = vpop.permute.xlu0 %766  ;;  %v6029_v25 = vpop.permute.xlu1 %770 }
 0x17b   :  { %166 = vrot.lane.b32.xlu1 %v6013_v23, %s5869_s14  ;;  %800 = vrot.lane.b32.xlu0 %v769_v17, %s5875_s19 }
 0x17e   :  { %v6031_v26 = vpop.permute.xlu0 %774  ;;  %v6037_v27 = vpop.permute.xlu1 %778 }
 0x17f   :  { %796 = vrot.lane.b32.xlu1 %v765_v14, %s5875_s19  ;;  %808 = vrot.lane.b32.xlu0 %v777_v20, %s5875_s19 }
 0x182   :  { %v6060_v28 = vpop.permute.xlu0 %780  ;;  %v6064_v30 = vpop.permute.xlu1 %782 }
 0x183   :  { %804 = vrot.lane.b32.xlu1 %v773_v16, %s5875_s19  ;;  %172 = vrot.lane.b32.xlu0 %v6013_v23, %s5871_s16 }
 0x186   :  { %v165_v29 = vpop.permute.xlu0 %164  ;;  %v171_v35 = vpop.permute.xlu1 %170 }
 0x187   :  { %178 = vrot.lane.b32.xlu1 %v6013_v23, %s5868_s13  ;;  %798 = vrot.lane.b32.xlu0 %v6023_v24, %s5875_s19  ;;  %v206_v45 = vcombine.low %v5984_v11, %v171_v35  ;;  %v207_v46 = vcombine.high %v5984_v11, %v171_v35 }
 0x189   :  { %v214_v51 = vrot.slane %v206_v45, %v6067_v44  ;;  %v221_v53 = vrot.slane %v207_v46, %v6067_v44 }
 0x18a   :  { %v177_v31 = vpop.permute.xlu0 %176  ;;  %v183_v39 = vpop.permute.xlu1 %182 }
 0x18b   :  { %802 = vrot.lane.b32.xlu1 %v6029_v25, %s5875_s19  ;;  %806 = vrot.lane.b32.xlu0 %v6031_v26, %s5875_s19  ;;  %v222_v42 = vcombine.low %v165_v29, %v177_v31  ;;  %v223_v43 = vcombine.high %v165_v29, %v177_v31 }
 0x18d   :  { %v230_v48 = vrot.slane %v222_v42, %v6067_v44  ;;  %v237_v50 = vrot.slane %v223_v43, %v6067_v44 }
 0x18e   :  { %v189_v38 = vpop.permute.xlu0 %188  ;;  %v195_v52 = vpop.permute.xlu1 %194 }
 0x18f   :  { %810 = vrot.lane.b32.xlu1 %v6037_v27, %s5875_s19  ;;  %184 = vrot.lane.b32.xlu0 %v6013_v23, %s5870_s15  ;;  %v270_v57 = vcombine.low %v214_v51, %v230_v48  ;;  %v271_v58 = vcombine.high %v214_v51, %v230_v48  ;;  %v286_v59 = vcombine.low %v221_v53, %v237_v50 }
 0x190   :  { %v287_v60 = vcombine.high %v221_v53, %v237_v50  ;;  %v238_v61 = vcombine.low %v183_v39, %v195_v52  ;;  %v239_v62 = vcombine.high %v183_v39, %v195_v52 }
 0x191   :  { %v278_v1 = vrot.slane %v270_v57, %v6075_v56  ;;  %v285_v2 = vrot.slane %v271_v58, %v6075_v56  ;;  %v294_v3 = vrot.slane %v286_v59, %v6075_v56 }
 0x192   :  { %v201_v49 = vpop.permute.xlu0 %200  ;;  %v301_v4 = vrot.slane %v287_v60, %v6075_v56  ;;  %v246_v5 = vrot.slane %v238_v61, %v6067_v44  ;;  %v253_v6 = vrot.slane %v239_v62, %v6067_v44 }
 0x193   :  { %190 = vrot.lane.b32.xlu1 %v6013_v23, %s5873_s17  ;;  %196 = vrot.lane.b32.xlu0 %v6013_v23, %s5872_s2  ;;  %v254_v54 = vcombine.low %v189_v38, %v201_v49  ;;  %v255_v55 = vcombine.high %v189_v38, %v201_v49  ;;  %v5292_v11 = vcombine.low %v278_v1, %v285_v2 }
 0x195   :  { %v262_v63 = vrot.slane %v254_v54, %v6067_v44  ;;  %v269_v0 = vrot.slane %v255_v55, %v6067_v44 }
 0x197   :  { %202 = vrot.lane.b32.xlu1 %v6013_v23, %s5874_s18  ;;  %1378 = vrot.lane.b32.xlu0 %v755_v19, %s5878_s20  ;;  %v302_v7 = vcombine.low %v246_v5, %v262_v63  ;;  %v303_v8 = vcombine.high %v246_v5, %v262_v63 }
 0x19b   :  { %1372 = vrot.lane.b32.xlu1 %v5947_v9, %s5878_s20  ;;  %1376 = vrot.lane.b32.xlu0 %v753_v13, %s5878_s20  ;;  %v318_v9 = vcombine.low %v253_v6, %v269_v0  ;;  %v5296_v13 = vcombine.low %v294_v3, %v301_v4 }
 0x19d   :  { %v518_v29 = vrot.slane %v5296_v13, %v6067_v44 }
 0x19f   :  { %1374 = vrot.lane.b32.xlu1 %v5961_v10, %s5878_s20  ;;  %1392 = vrot.lane.b32.xlu0 %v769_v17, %s5878_s20  ;;  %v319_v10 = vcombine.high %v253_v6, %v269_v0  ;;  %v326_v17 = vrot.slane %v318_v9, %v6075_v56 }
 0x1a1   :  { %v333_v19 = vrot.slane %v319_v10, %v6075_v56 }
 0x1a3   :  { %1382 = vrot.lane.b32.xlu1 %v759_v22, %s5878_s20  ;;  %v5297_v34 = vcombine.low %v326_v17, %v333_v19  ;;  %v5299_v35 = vcombine.high %v326_v17, %v333_v19 }
 0x1a5   :  { %v525_v53 = vrot.slane %v5297_v34, %v6067_v44 }
 0x1a7   :  { %1386 = vrot.lane.b32.xlu1 %v763_v21, %s5878_s20  ;;  %v486_v21 = vrot.slane %v5292_v11, %v6067_v44 }
 0x1ab   :  { %1380 = vrot.lane.b32.xlu1 %v757_v15, %s5878_s20  ;;  %v310_v15 = vrot.slane %v302_v7, %v6075_v56 }
 0x1af   :  { %1384 = vrot.lane.b32.xlu1 %v761_v12, %s5878_s20  ;;  %v5294_v12 = vcombine.high %v278_v1, %v285_v2 }
 0x1b1   :  { %v502_v22 = vrot.slane %v5294_v12, %v6067_v44 }
 0x1b3   :  { %1388 = vrot.lane.b32.xlu1 %v765_v14, %s5878_s20  ;;  %v5298_v14 = vcombine.high %v294_v3, %v301_v4  ;;  %v543_v42 = vcombine.high %v486_v21, %v502_v22  ;;  %v542_v45 = vcombine.low %v486_v21, %v502_v22 }
 0x1b5   :  { %v534_v31 = vrot.slane %v5298_v14, %v6067_v44  ;;  %v6104_v59 = vrot.slane %v542_v45, %v6075_v56  ;;  %v6110_v61 = vrot.slane %v543_v42, %v6075_v56 }
 0x1b7   :  { %1396 = vrot.lane.b32.xlu1 %v773_v16, %s5878_s20  ;;  %v317_v16 = vrot.slane %v303_v8, %v6075_v56  ;;  %v575_v43 = vcombine.high %v518_v29, %v534_v31  ;;  %v574_v46 = vcombine.low %v518_v29, %v534_v31 }
 0x1b9   :  { %v5293_v32 = vcombine.low %v310_v15, %v317_v16  ;;  %v5295_v33 = vcombine.high %v310_v15, %v317_v16  ;;  %v6107_v60 = vrot.slane %v574_v46, %v6075_v56  ;;  %v6113_v62 = vrot.slane %v575_v43, %v6075_v56 }
 0x1bb   :  { %1400 = vrot.lane.b32.xlu1 %v777_v20, %s5878_s20  ;;  %v493_v51 = vrot.slane %v5293_v32, %v6067_v44  ;;  %v509_v52 = vrot.slane %v5295_v33, %v6067_v44  ;;  %v606_v10 = vcombine.low %v6104_v59, %v6107_v60  ;;  %v607_v11 = vcombine.high %v6104_v59, %v6107_v60 }
 0x1bc   :  { %v608_v12 = vcombine.low %v6110_v61, %v6113_v62 }
 0x1bd   :  { %v558_v3 = vcombine.low %v493_v51, %v509_v52  ;;  %v559_v17 = vcombine.high %v493_v51, %v509_v52 }
 0x1bf   :  { %v6130_v22 = vrot.slane %v558_v3, %v6075_v56 }
 0x1d9   :  { %v785_v20 = vpop.permute.xlu1 %784 }
 0x1dd   :  { %v793_v36 = vpop.permute.xlu1 %792  ;;  %v789_v37 = vpop.permute.xlu0 %788 }
 0x1de   :  { %v844_v38 = vcombine.low %v785_v20, %v793_v36  ;;  %v845_v39 = vcombine.high %v785_v20, %v793_v36  ;;  %v828_v40 = vcombine.low %v6060_v28, %v789_v37  ;;  %v829_v41 = vcombine.high %v6060_v28, %v789_v37 }
 0x1df   :  { %v541_v28 = vrot.slane %v5299_v35, %v6067_v44 }
 0x1e0   :  { %v852_v47 = vrot.slane %v844_v38, %v6067_v44  ;;  %v859_v48 = vrot.slane %v845_v39, %v6067_v44  ;;  %v836_v49 = vrot.slane %v828_v40, %v6067_v44  ;;  %v843_v50 = vrot.slane %v829_v41, %v6067_v44 }
 0x1e1   :  { %v590_v4 = vcombine.low %v525_v53, %v541_v28  ;;  %v591_v19 = vcombine.high %v525_v53, %v541_v28 }
 0x1e2   :  { %v892_v54 = vcombine.low %v836_v49, %v852_v47  ;;  %v893_v55 = vcombine.high %v836_v49, %v852_v47  ;;  %v908_v57 = vcombine.low %v843_v50, %v859_v48  ;;  %v909_v58 = vcombine.high %v843_v50, %v859_v48 }
 0x1e3   :  { %v6133_v29 = vrot.slane %v590_v4, %v6075_v56  ;;  %v6146_v47 = vrot.slane %v559_v17, %v6075_v56  ;;  %v6149_v48 = vrot.slane %v591_v19, %v6075_v56 }
 0x1e4   :  { %v900_v63 = vrot.slane %v892_v54, %v6075_v56  ;;  %v907_v0 = vrot.slane %v893_v55, %v6075_v56  ;;  %v916_v1 = vrot.slane %v908_v57, %v6075_v56  ;;  %v923_v2 = vrot.slane %v909_v58, %v6075_v56 }
 0x1e5   :  { %v787_v5 = vpop.permute.xlu0 %786  ;;  %v609_v55 = vcombine.high %v6110_v61, %v6113_v62  ;;  %v610_v3 = vcombine.low %v6130_v22, %v6133_v29  ;;  %v611_v4 = vcombine.high %v6130_v22, %v6133_v29 }
 0x1e6   :  { %v5308_v6 = vcombine.low %v900_v63, %v907_v0  ;;  %v5310_v7 = vcombine.high %v900_v63, %v907_v0  ;;  %v5312_v8 = vcombine.low %v916_v1, %v923_v2  ;;  %v5314_v9 = vcombine.high %v916_v1, %v923_v2 }
 0x1e8   :  { %v1108_v13 = vrot.slane %v5308_v6, %v6067_v44  ;;  %v1124_v14 = vrot.slane %v5310_v7, %v6067_v44  ;;  %v1140_v15 = vrot.slane %v5312_v8, %v6067_v44  ;;  %v1156_v16 = vrot.slane %v5314_v9, %v6067_v44 }
 0x1e9   :  { %v791_v20 = vpop.permute.xlu1 %790  ;;  %v795_v21 = vpop.permute.xlu0 %794  ;;  %v613_v6 = vcombine.high %v6146_v47, %v6149_v48 }
 0x1ea   :  { %v964_v31 = vcombine.low %v6064_v30, %v791_v20  ;;  %v965_v32 = vcombine.high %v6064_v30, %v791_v20  ;;  %v980_v33 = vcombine.low %v787_v5, %v795_v21  ;;  %v981_v34 = vcombine.high %v787_v5, %v795_v21 }
 0x1eb   :  { %v1164_v35 = vcombine.low %v1108_v13, %v1124_v14  ;;  %v1165_v36 = vcombine.high %v1108_v13, %v1124_v14  ;;  %v1196_v37 = vcombine.low %v1140_v15, %v1156_v16  ;;  %v1197_v38 = vcombine.high %v1140_v15, %v1156_v16 }
 0x1ec   :  { %v972_v39 = vrot.slane %v964_v31, %v6067_v44  ;;  %v979_v40 = vrot.slane %v965_v32, %v6067_v44  ;;  %v988_v41 = vrot.slane %v980_v33, %v6067_v44  ;;  %v995_v42 = vrot.slane %v981_v34, %v6067_v44 }
 0x1ed   :  { %v6141_v43 = vpop.permute.xlu1 %166  ;;  %v801_v45 = vpop.permute.xlu0 %800  ;;  %v1172_v46 = vrot.slane %v1164_v35, %v6075_v56  ;;  %v1204_v30 = vrot.slane %v1196_v37, %v6075_v56  ;;  %v6152_v28 = vrot.slane %v1165_v36, %v6075_v56  ;;  %v6155_v54 = vrot.slane %v1197_v38, %v6075_v56 }
 0x1ee   :  { %v1028_v49 = vcombine.low %v972_v39, %v988_v41  ;;  %v1029_v50 = vcombine.high %v972_v39, %v988_v41  ;;  %v1044_v51 = vcombine.low %v979_v40, %v995_v42  ;;  %v1045_v52 = vcombine.high %v979_v40, %v995_v42 }
 0x1ef   :  { %v1228_v53 = vcombine.low %v1172_v46, %v1204_v30  ;;  %v612_v5 = vcombine.low %v6146_v47, %v6149_v48  ;;  %v1229_v14 = vcombine.high %v1172_v46, %v1204_v30  ;;  %v1230_v17 = vcombine.low %v6152_v28, %v6155_v54 }
 0x1f0   :  { %v1036_v57 = vrot.slane %v1028_v49, %v6075_v56  ;;  %v1043_v58 = vrot.slane %v1029_v50, %v6075_v56  ;;  %v1052_v63 = vrot.slane %v1044_v51, %v6075_v56  ;;  %v1059_v0 = vrot.slane %v1045_v52, %v6075_v56 }
 0x1f1   :  { %5495 = vmatpush3.xpose.msk.msra.mxu1 %vm1964_vm2, %v1228_v53  ;;  %v797_v1 = vpop.permute.xlu1 %796  ;;  %v809_v2 = vpop.permute.xlu0 %808  ;;  %v1231_v36 = vcombine.high %v6152_v28, %v6155_v54 }
 0x1f2   :  { %v5316_v7 = vcombine.low %v1036_v57, %v1043_v58  ;;  %v5318_v8 = vcombine.high %v1036_v57, %v1043_v58  ;;  %v5320_v9 = vcombine.low %v1052_v63, %v1059_v0  ;;  %v5322_v13 = vcombine.high %v1052_v63, %v1059_v0  ;;  %5499 = vmatprep.subr.mxu1 %v5876_v18 }
 0x1f3   :  { %v876_v15 = vcombine.low %v801_v45, %v809_v2  ;;  %v877_v16 = vcombine.high %v801_v45, %v809_v2 }
 0x1f4   :  { %v1244_v19 = vrot.slane %v5316_v7, %v6067_v44  ;;  %v1260_v20 = vrot.slane %v5318_v8, %v6067_v44  ;;  %v1276_v21 = vrot.slane %v5320_v9, %v6067_v44  ;;  %v1292_v31 = vrot.slane %v5322_v13, %v6067_v44  ;;  %5497 = vmatmul.mubr.msk.f32.vlgmr.msra.gmra.mxu1 %vm1964_vm2, %v606_v10 }
 0x1f5   :  { %v884_v32 = vrot.slane %v876_v15, %v6067_v44  ;;  %v891_v33 = vrot.slane %v877_v16, %v6067_v44  ;;  %5500 = vmatpush3.xpose.msk.msra.mxu1 %vm1964_vm2, %v1229_v14  ;;  %v805_v34 = vpop.permute.xlu1 %804  ;;  %v173_v35 = vpop.permute.xlu0 %172  ;;  %5501 = vmatprep.mubr.msk.f32.mxu1 %vm5877_vm1, %v5876_v18 }
 0x1f6   :  { %v1300_v37 = vcombine.low %v1244_v19, %v1260_v20  ;;  %v1301_v38 = vcombine.high %v1244_v19, %v1260_v20  ;;  %v1332_v39 = vcombine.low %v1276_v21, %v1292_v31  ;;  %v1333_v40 = vcombine.high %v1276_v21, %v1292_v31  ;;  %5504 = vmatprep.subr.mxu1 %v5876_v18 }
 0x1f7   :  { %v860_v10 = vcombine.low %v797_v1, %v805_v34  ;;  %v861_v41 = vcombine.high %v797_v1, %v805_v34  ;;  %v342_v42 = vcombine.low %v6013_v23, %v173_v35  ;;  %v343_v45 = vcombine.high %v6013_v23, %v173_v35 }
 0x1f8   :  { %5502 = vmatmul.mubr.msk.f32.vlgmr.msra.gmra.mxu1 %vm1964_vm2, %v607_v11  ;;  %v6198_v46 = vrot.slane %v1300_v37, %v6075_v56  ;;  %v6201_v30 = vrot.slane %v1332_v39, %v6075_v56  ;;  %v6204_v49 = vrot.slane %v1301_v38, %v6075_v56  ;;  %v6207_v50 = vrot.slane %v1333_v40, %v6075_v56 }
 0x1f9   :  { %v868_v51 = vrot.slane %v860_v10, %v6067_v44  ;;  %v875_v23 = vrot.slane %v861_v41, %v6067_v44  ;;  %v350_v59 = vrot.slane %v342_v42, %v6067_v44  ;;  %v357_v60 = vrot.slane %v343_v45, %v6067_v44  ;;  %5505 = vmatpush3.xpose.msk.msra.mxu1 %vm1964_vm2, %v1230_v17  ;;  %v179_v11 = vpop.permute.xlu1 %178  ;;  %v6214_v52 = vpop.permute.xlu0 %798 }
 0x1fa   :  { %v358_v53 = vcombine.low %v6141_v43, %v179_v11  ;;  %v359_v28 = vcombine.high %v6141_v43, %v179_v11  ;;  %5506 = vmatprep.mubr.msk.f32.mxu1 %vm5877_vm1, %v5876_v18  ;;  %5509 = vmatprep.subr.mxu1 %v5876_v18  ;;  %v1364_v54 = vcombine.low %v6198_v46, %v6201_v30 }
 0x1fb   :  { %v924_v57 = vcombine.low %v868_v51, %v884_v32  ;;  %v925_v58 = vcombine.high %v868_v51, %v884_v32  ;;  %v940_v63 = vcombine.low %v875_v23, %v891_v33  ;;  %v941_v0 = vcombine.high %v875_v23, %v891_v33 }
 0x1fc   :  { %v366_v1 = vrot.slane %v358_v53, %v6067_v44  ;;  %v373_v2 = vrot.slane %v359_v28, %v6067_v44  ;;  %5507 = vmatmul.mubr.msk.f32.vlgmr.msra.gmra.mxu1 %vm1964_vm2, %v608_v12  ;;  %v1365_v43 = vcombine.high %v6198_v46, %v6201_v30  ;;  %v1366_v7 = vcombine.low %v6204_v49, %v6207_v50 }
 0x1fd   :  { %v932_v8 = vrot.slane %v924_v57, %v6075_v56  ;;  %v939_v9 = vrot.slane %v925_v58, %v6075_v56  ;;  %v948_v13 = vrot.slane %v940_v63, %v6075_v56  ;;  %v955_v14 = vrot.slane %v941_v0, %v6075_v56  ;;  %5510 = vmatpush3.xpose.msk.msra.mxu1 %vm1964_vm2, %v1231_v36  ;;  %v803_v15 = vpop.permute.xlu1 %802  ;;  %v807_v16 = vpop.permute.xlu0 %806 }
 0x1fe   :  { %v406_v17 = vcombine.low %v350_v59, %v366_v1  ;;  %v407_v12 = vcombine.high %v350_v59, %v366_v1  ;;  %v422_v19 = vcombine.low %v357_v60, %v373_v2  ;;  %v423_v20 = vcombine.high %v357_v60, %v373_v2  ;;  %5511 = vmatprep.mubr.msk.f32.mxu1 %vm5877_vm1, %v5876_v18 }
 0x1ff   :  { %v5309_v21 = vcombine.low %v932_v8, %v939_v9  ;;  %v5311_v31 = vcombine.high %v932_v8, %v939_v9  ;;  %v5313_v32 = vcombine.low %v948_v13, %v955_v14  ;;  %v5315_v33 = vcombine.high %v948_v13, %v955_v14  ;;  %5519 = vmatprep.subr.mxu1 %v5876_v18 }
 0x200   :  { %v414_v34 = vrot.slane %v406_v17, %v6075_v56  ;;  %v421_v35 = vrot.slane %v407_v12, %v6075_v56  ;;  %v430_v36 = vrot.slane %v422_v19, %v6075_v56  ;;  %v437_v37 = vrot.slane %v423_v20, %v6075_v56  ;;  %5512 = vmatmul.mubr.msk.f32.vlgmr.msra.gmra.mxu1 %vm1964_vm2, %v609_v55 }
 0x201   :  { %v1115_v38 = vrot.slane %v5309_v21, %v6067_v44  ;;  %v1131_v39 = vrot.slane %v5311_v31, %v6067_v44  ;;  %v6252_v40 = vrot.slane %v5313_v32, %v6067_v44  ;;  %v1163_v10 = vrot.slane %v5315_v33, %v6067_v44  ;;  %v811_v41 = vpop.permute.xlu1 %810  ;;  %5521 = vmatprep.mubr.msk.f32.mxu1 %vm5877_vm1, %v5876_v18  ;;  %v185_v61 = vpop.permute.xlu0 %184 }
 0x202   :  { %v5300_v42 = vcombine.low %v414_v34, %v421_v35  ;;  %v5302_v45 = vcombine.high %v414_v34, %v421_v35  ;;  %v5304_v51 = vcombine.low %v430_v36, %v437_v37  ;;  %v5306_v23 = vcombine.high %v430_v36, %v437_v37 }
 0x203   :  { %v1180_v62 = vcombine.low %v1115_v38, %v1131_v39  ;;  %v1181_v55 = vcombine.high %v1115_v38, %v1131_v39  ;;  %v1212_v59 = vcombine.low %v6252_v40, %v1163_v10  ;;  %v1213_v60 = vcombine.high %v6252_v40, %v1163_v10 }
 0x204   :  { %v6260_v11 = vrot.slane %v5300_v42, %v6067_v44  ;;  %v6263_v53 = vrot.slane %v5302_v45, %v6067_v44  ;;  %v6266_v28 = vrot.slane %v5304_v51, %v6067_v44  ;;  %v6269_v57 = vrot.slane %v5306_v23, %v6067_v44 }
 0x205   :  { %v996_v58 = vcombine.low %v6214_v52, %v807_v16  ;;  %v997_v63 = vcombine.high %v6214_v52, %v807_v16  ;;  %v1012_v0 = vcombine.low %v803_v15, %v811_v41  ;;  %v1013_v1 = vcombine.high %v803_v15, %v811_v41  ;;  %v191_v2 = vpop.permute.xlu1 %190  ;;  %v197_v17 = vpop.permute.xlu0 %196 }
 0x206   :  { %v678_v8 = vcombine.low %v6260_v11, %v6263_v53  ;;  %v679_v9 = vcombine.high %v6260_v11, %v6263_v53  ;;  %v710_v13 = vcombine.low %v6266_v28, %v6269_v57  ;;  %v711_v14 = vcombine.high %v6266_v28, %v6269_v57 }
 0x207   :  { %v1004_v12 = vrot.slane %v996_v58, %v6067_v44  ;;  %v1011_v52 = vrot.slane %v997_v63, %v6067_v44  ;;  %v1020_v15 = vrot.slane %v1012_v0, %v6067_v44  ;;  %v1027_v16 = vrot.slane %v1013_v1, %v6067_v44 }
 0x208   :  { %v374_v19 = vcombine.low %v185_v61, %v197_v17  ;;  %v375_v20 = vcombine.high %v185_v61, %v197_v17  ;;  %v1188_v21 = vrot.slane %v1180_v62, %v6075_v56  ;;  %v1220_v31 = vrot.slane %v1212_v59, %v6075_v56 }
 0x209   :  { %v1060_v32 = vcombine.low %v1004_v12, %v1020_v15  ;;  %v1061_v33 = vcombine.high %v1004_v12, %v1020_v15  ;;  %v1076_v34 = vcombine.low %v1011_v52, %v1027_v16  ;;  %v1077_v35 = vcombine.high %v1011_v52, %v1027_v16  ;;  %v203_v36 = vpop.permute.xlu1 %202  ;;  %v1379_v28 = vpop.permute.xlu0 %1378 }
 0x20a   :  { %v382_v37 = vrot.slane %v374_v19, %v6067_v44  ;;  %v389_v38 = vrot.slane %v375_v20, %v6067_v44  ;;  %v1232_v39 = vcombine.low %v1188_v21, %v1220_v31  ;;  %v1233_v40 = vcombine.high %v1188_v21, %v1220_v31 }
 0x20b   :  { %v1068_v10 = vrot.slane %v1060_v32, %v6075_v56  ;;  %v1075_v41 = vrot.slane %v1061_v33, %v6075_v56  ;;  %v1084_v42 = vrot.slane %v1076_v34, %v6075_v56  ;;  %v1091_v45 = vrot.slane %v1077_v35, %v6075_v56 }
 0x20c   :  { %5515 = vmatpush3.xpose.msk.msra.mxu0 %vm1964_vm2, %v1232_v39  ;;  %5520 = vmatpush3.xpose.msk.msra.mxu1 %vm1964_vm2, %v1233_v40  ;;  %v390_v51 = vcombine.low %v191_v2, %v203_v36  ;;  %v391_v23 = vcombine.high %v191_v2, %v203_v36  ;;  %v1195_v61 = vrot.slane %v1181_v55, %v6075_v56 }
 0x20d   :  { %v5317_v62 = vcombine.low %v1068_v10, %v1075_v41  ;;  %v5319_v59 = vcombine.high %v1068_v10, %v1075_v41  ;;  %v5321_v58 = vcombine.low %v1084_v42, %v1091_v45  ;;  %v5323_v63 = vcombine.high %v1084_v42, %v1091_v45  ;;  %5524 = vmatprep.subr.mxu0 %v5876_v18  ;;  %v6297_v0 = vpop.permute.xlu1 %1372 }
 0x20e   :  { %v398_v1 = vrot.slane %v390_v51, %v6067_v44  ;;  %v405_v17 = vrot.slane %v391_v23, %v6067_v44  ;;  %5529 = vmatprep.subr.mxu1 %v5876_v18  ;;  %v1227_v12 = vrot.slane %v1213_v60, %v6075_v56  ;;  %v6304_v2 = vrot.slane %v678_v8, %v6075_v56 }
 0x20f   :  { %v6307_v55 = vrot.slane %v5317_v62, %v6067_v44  ;;  %v6310_v52 = vrot.slane %v5319_v59, %v6067_v44  ;;  %v6313_v15 = vrot.slane %v5321_v58, %v6067_v44  ;;  %v6316_v16 = vrot.slane %v5323_v63, %v6067_v44  ;;  %5517 = vmatmul.mubr.msk.f32.vlgmr.msra.gmra.mxu0 %vm1964_vm2, %v610_v3 }
 0x210   :  { %v438_v60 = vcombine.low %v382_v37, %v398_v1  ;;  %v439_v8 = vcombine.high %v382_v37, %v398_v1  ;;  %v454_v19 = vcombine.low %v389_v38, %v405_v17  ;;  %v455_v20 = vcombine.high %v389_v38, %v405_v17  ;;  %5522 = vmatmul.mubr.msk.f32.vlgmr.msra.gmra.mxu1 %vm1964_vm2, %v611_v4 }
 0x211   :  { %v1316_v21 = vcombine.low %v6307_v55, %v6310_v52  ;;  %v1317_v31 = vcombine.high %v6307_v55, %v6310_v52  ;;  %v1348_v32 = vcombine.low %v6313_v15, %v6316_v16  ;;  %v1349_v3 = vcombine.high %v6313_v15, %v6316_v16  ;;  %5526 = vmatprep.mubr.msk.f32.mxu0 %vm5877_vm1, %v5876_v18  ;;  %v1375_v33 = vpop.permute.xlu1 %1374 }
 0x212   :  { %v446_v22 = vrot.slane %v438_v60, %v6075_v56  ;;  %v453_v29 = vrot.slane %v439_v8, %v6075_v56  ;;  %v462_v4 = vrot.slane %v454_v19, %v6075_v56  ;;  %v469_v34 = vrot.slane %v455_v20, %v6075_v56  ;;  %5531 = vmatprep.mubr.msk.f32.mxu1 %vm5877_vm1, %v5876_v18 }
 0x213   :  { %v1234_v35 = vcombine.low %v1195_v61, %v1227_v12  ;;  %v1235_v36 = vcombine.high %v1195_v61, %v1227_v12  ;;  %v718_v37 = vrot.slane %v710_v13, %v6075_v56  ;;  %v1367_v38 = vcombine.high %v6204_v49, %v6207_v50 }
 0x214   :  { %v5301_v39 = vcombine.low %v446_v22, %v453_v29  ;;  %v5303_v40 = vcombine.high %v446_v22, %v453_v29  ;;  %v5305_v10 = vcombine.low %v462_v4, %v469_v34  ;;  %v5307_v41 = vcombine.high %v462_v4, %v469_v34 }
 0x215   :  { %5525 = vmatpush3.xpose.msk.msra.mxu0 %vm1964_vm2, %v1234_v35  ;;  %5530 = vmatpush3.xpose.msk.msra.mxu1 %vm1964_vm2, %v1235_v36  ;;  %v742_v42 = vcombine.low %v6304_v2, %v718_v37  ;;  %v743_v45 = vcombine.high %v6304_v2, %v718_v37  ;;  %v1383_v51 = vpop.permute.xlu1 %1382  ;;  %v693_v13 = vrot.slane %v679_v9, %v6075_v56 }
 0x216   :  { %v6357_v23 = vrot.slane %v5301_v39, %v6067_v44  ;;  %v6360_v61 = vrot.slane %v5303_v40, %v6067_v44  ;;  %v6363_v62 = vrot.slane %v5305_v10, %v6067_v44  ;;  %v6366_v59 = vrot.slane %v5307_v41, %v6067_v44  ;;  %5534 = vmatprep.subr.mxu0 %v5876_v18 }
 0x217   :  { %5539 = vmatprep.subr.mxu1 %v5876_v18  ;;  %v1556_v58 = vcombine.low %v1375_v33, %v1383_v51  ;;  %v1557_v63 = vcombine.high %v1375_v33, %v1383_v51  ;;  %v725_v11 = vrot.slane %v711_v14, %v6075_v56  ;;  %v1324_v53 = vrot.slane %v1316_v21, %v6075_v56 }
 0x218   :  { %v694_v9 = vcombine.low %v6357_v23, %v6360_v61  ;;  %v695_v1 = vcombine.high %v6357_v23, %v6360_v61  ;;  %v726_v17 = vcombine.low %v6363_v62, %v6366_v59  ;;  %v727_v12 = vcombine.high %v6363_v62, %v6366_v59  ;;  %5527 = vmatmul.mubr.msk.f32.vlgmr.msra.gmra.mxu0 %vm1964_vm2, %v612_v5 }
 0x219   :  { %5532 = vmatmul.mubr.msk.f32.vlgmr.msra.gmra.mxu1 %vm1964_vm2, %v613_v6  ;;  %5535 = vmatpush3.xpose.msk.msra.mxu0 %vm1964_vm2, %v1364_v54  ;;  %v1564_v57 = vrot.slane %v1556_v58, %v6067_v44  ;;  %v1571_v14 = vrot.slane %v1557_v63, %v6067_v44  ;;  %v744_v2 = vcombine.low %v693_v13, %v725_v11  ;;  %v1387_v60 = vpop.permute.xlu1 %1386 }
 0x21a   :  { %5540 = vmatpush3.xpose.msk.msra.mxu1 %vm1964_vm2, %v1365_v43  ;;  %5536 = vmatprep.mubr.msk.f32.mxu0 %vm5877_vm1, %v5876_v18  ;;  %v745_v47 = vcombine.high %v693_v13, %v725_v11  ;;  %v1356_v48 = vrot.slane %v1348_v32, %v6075_v56  ;;  %v1572_v5 = vcombine.low %v1379_v28, %v1387_v60 }
 0x21b   :  { %5541 = vmatprep.mubr.msk.f32.mxu1 %vm5877_vm1, %v5876_v18  ;;  %5544 = vmatprep.subr.mxu0 %v5876_v18  ;;  %v1573_v6 = vcombine.high %v1379_v28, %v1387_v60  ;;  %v702_v54 = vrot.slane %v694_v9, %v6075_v56  ;;  %v734_v8 = vrot.slane %v726_v17, %v6075_v56 }
 0x21c   :  { %5537 = vmatmul.mubr.msk.f32.vlgmr.msra.gmra.mxu0 %vm1964_vm2, %v742_v42  ;;  %5549 = vmatprep.subr.mxu1 %v5876_v18  ;;  %v1368_v46 = vcombine.low %v1324_v53, %v1356_v48  ;;  %v1369_v30 = vcombine.high %v1324_v53, %v1356_v48  ;;  %v1580_v43 = vrot.slane %v1572_v5, %v6067_v44  ;;  %v1377_v42 = vpop.permute.xlu0 %1376 }
 0x21d   :  { %5542 = vmatmul.mubr.msk.f32.vlgmr.msra.gmra.mxu1 %vm1964_vm2, %v743_v45  ;;  %5545 = vmatpush3.xpose.msk.msra.mxu0 %vm1964_vm2, %v1366_v7  ;;  %v1587_v19 = vrot.slane %v1573_v6, %v6067_v44  ;;  %v746_v20 = vcombine.low %v702_v54, %v734_v8  ;;  %v747_v21 = vcombine.high %v702_v54, %v734_v8  ;;  %v1381_v32 = vpop.permute.xlu1 %1380 }
 0x21e   :  { %5550 = vmatpush3.xpose.msk.msra.mxu1 %vm1964_vm2, %v1367_v38  ;;  %5546 = vmatprep.mubr.msk.f32.mxu0 %vm5877_vm1, %v5876_v18  ;;  %v1620_v33 = vcombine.low %v1564_v57, %v1580_v43  ;;  %v1621_v22 = vcombine.high %v1564_v57, %v1580_v43  ;;  %v1331_v29 = vrot.slane %v1317_v31, %v6075_v56 }
 0x21f   :  { %5551 = vmatprep.mubr.msk.f32.mxu1 %vm5877_vm1, %v5876_v18  ;;  %5554 = vmatprep.subr.mxu0 %v5876_v18  ;;  %v1636_v49 = vcombine.low %v1571_v14, %v1587_v19  ;;  %v1637_v50 = vcombine.high %v1571_v14, %v1587_v19  ;;  %v1363_v7 = vrot.slane %v1349_v3, %v6075_v56 }
 0x220   :  { %5547 = vmatmul.mubr.msk.f32.vlgmr.msra.gmra.mxu0 %vm1964_vm2, %v744_v2  ;;  %5559 = vmatprep.subr.mxu1 %v5876_v18  ;;  %v1628_v4 = vrot.slane %v1620_v33, %v6075_v56  ;;  %v1635_v55 = vrot.slane %v1621_v22, %v6075_v56  ;;  %v1420_v52 = vcombine.low %v6297_v0, %v1381_v32  ;;  %v1393_v43 = vpop.permute.xlu0 %1392 }
 0x221   :  { %5552 = vmatmul.mubr.msk.f32.vlgmr.msra.gmra.mxu1 %vm1964_vm2, %v745_v47  ;;  %5555 = vmatpush3.xpose.msk.msra.mxu0 %vm1964_vm2, %v1368_v46  ;;  %v1644_v31 = vrot.slane %v1636_v49, %v6075_v56  ;;  %v1651_v34 = vrot.slane %v1637_v50, %v6075_v56  ;;  %v1370_v15 = vcombine.low %v1331_v29, %v1363_v7  ;;  %v1385_v16 = vpop.permute.xlu1 %1384 }
 0x222   :  { %5560 = vmatpush3.xpose.msk.msra.mxu1 %vm1964_vm2, %v1369_v30  ;;  %v5332_v3 = vcombine.low %v1628_v4, %v1635_v55  ;;  %v5334_v35 = vcombine.high %v1628_v4, %v1635_v55  ;;  %5556 = vmatprep.mubr.msk.f32.mxu0 %vm5877_vm1, %v5876_v18  ;;  %v1371_v36 = vcombine.high %v1331_v29, %v1363_v7 }
 0x223   :  { %v5336_v37 = vcombine.low %v1644_v31, %v1651_v34  ;;  %v5338_v38 = vcombine.high %v1644_v31, %v1651_v34  ;;  %5561 = vmatprep.mubr.msk.f32.mxu1 %vm5877_vm1, %v5876_v18  ;;  %5564 = vmatprep.subr.mxu0 %v5876_v18  ;;  %v1421_v39 = vcombine.high %v6297_v0, %v1381_v32 }
 0x224   :  { %v1836_v40 = vrot.slane %v5332_v3, %v6067_v44  ;;  %v1852_v10 = vrot.slane %v5334_v35, %v6067_v44  ;;  %5569 = vmatprep.subr.mxu1 %v5876_v18  ;;  %5557 = vmatmul.mubr.msk.f32.vlgmr.msra.gmra.mxu0 %vm1964_vm2, %v746_v20  ;;  %v1428_v41 = vrot.slane %v1420_v52, %v6067_v44 }
 0x225   :  { %v1868_v45 = vrot.slane %v5336_v37, %v6067_v44  ;;  %v1884_v51 = vrot.slane %v5338_v38, %v6067_v44  ;;  %5562 = vmatmul.mubr.msk.f32.vlgmr.msra.gmra.mxu1 %vm1964_vm2, %v747_v21  ;;  %5565 = vmatpush3.xpose.msk.msra.mxu0 %vm1964_vm2, %v1370_v15  ;;  %v1435_v0 = vrot.slane %v1421_v39, %v6067_v44  ;;  %v1389_v13 = vpop.permute.xlu1 %1388 }
 0x226   :  { %5570 = vmatpush3.xpose.msk.msra.mxu1 %vm1964_vm2, %v1371_v36  ;;  %5566 = vmatprep.mubr.msk.f32.mxu0 %vm5877_vm1, %v5876_v18  ;;  %v709_v58 = vrot.slane %v695_v1, %v6075_v56  ;;  %v741_v63 = vrot.slane %v727_v12, %v6075_v56  ;;  %v1436_v11 = vcombine.low %v1377_v42, %v1385_v16 }
 0x227   :  { %5571 = vmatprep.mubr.msk.f32.mxu1 %vm5877_vm1, %v5876_v18  ;;  %v1437_v53 = vcombine.high %v1377_v42, %v1385_v16  ;;  %5574 = vmatprep.subr.mxu0 %v5876_v18  ;;  %v1892_v9 = vcombine.low %v1836_v40, %v1852_v10  ;;  %v1924_v17 = vcombine.low %v1868_v45, %v1884_v51 }
 0x228   :  { %v748_v28 = vcombine.low %v709_v58, %v741_v63  ;;  %v749_v57 = vcombine.high %v709_v58, %v741_v63  ;;  %v1444_v14 = vrot.slane %v1436_v11, %v6067_v44  ;;  %5579 = vmatprep.subr.mxu1 %v5876_v18  ;;  %v1893_v23 = vcombine.high %v1836_v40, %v1852_v10 }
 0x229   :  { %v1451_v61 = vrot.slane %v1437_v53, %v6067_v44  ;;  %v1397_v62 = vpop.permute.xlu1 %1396  ;;  %v6476_v59 = vrot.slane %v1892_v9, %v6075_v56  ;;  %v6479_v1 = vrot.slane %v1924_v17, %v6075_v56  ;;  %v1925_v12 = vcombine.high %v1868_v45, %v1884_v51 }
 0x22a   :  { %5567 = vmatmul.mubr.msk.f32.vlgmr.msra.gmra.mxu0 %vm1964_vm2, %v748_v28  ;;  %5572 = vmatmul.mubr.msk.f32.vlgmr.msra.gmra.mxu1 %vm1964_vm2, %v749_v57  ;;  %v1484_v2 = vcombine.low %v1428_v41, %v1444_v14  ;;  %v1485_v60 = vcombine.high %v1428_v41, %v1444_v14  ;;  %v1452_v47 = vcombine.low %v1389_v13, %v1397_v62 }
 0x22b   :  { %v1500_v48 = vcombine.low %v1435_v0, %v1451_v61  ;;  %v1501_v5 = vcombine.high %v1435_v0, %v1451_v61  ;;  %v1453_v6 = vcombine.high %v1389_v13, %v1397_v62  ;;  %5576 = vmatprep.mubr.msk.f32.mxu0 %vm5877_vm1, %v5876_v18  ;;  %5581 = vmatprep.mubr.msk.f32.mxu1 %vm5877_vm1, %v5876_v18 }
 0x22c   :  { %v1492_v54 = vrot.slane %v1484_v2, %v6075_v56  ;;  %v1499_v8 = vrot.slane %v1485_v60, %v6075_v56  ;;  %v1460_v46 = vrot.slane %v1452_v47, %v6067_v44  ;;  %v1956_v30 = vcombine.low %v6476_v59, %v6479_v1 }
 0x22d   :  { %v1508_v19 = vrot.slane %v1500_v48, %v6075_v56  ;;  %v1515_v20 = vrot.slane %v1501_v5, %v6075_v56  ;;  %v1467_v21 = vrot.slane %v1453_v6, %v6067_v44  ;;  %v1401_v32 = vpop.permute.xlu1 %1400  ;;  %v6496_v33 = vrot.slane %v1893_v23, %v6075_v56 }
 0x22e   :  { %v5324_v22 = vcombine.low %v1492_v54, %v1499_v8  ;;  %v5326_v29 = vcombine.high %v1492_v54, %v1499_v8  ;;  %v1468_v49 = vcombine.low %v1393_v43, %v1401_v32  ;;  %v1469_v50 = vcombine.high %v1393_v43, %v1401_v32 }
 0x22f   :  { %v5328_v7 = vcombine.low %v1508_v19, %v1515_v20  ;;  %v5330_v4 = vcombine.high %v1508_v19, %v1515_v20  ;;  %v6499_v55 = vrot.slane %v1925_v12, %v6075_v56  ;;  %v1957_v52 = vcombine.high %v6476_v59, %v6479_v1 }
 0x230   :  { %v1700_v31 = vrot.slane %v5324_v22, %v6067_v44  ;;  %v1716_v34 = vrot.slane %v5326_v29, %v6067_v44  ;;  %v1476_v15 = vrot.slane %v1468_v49, %v6067_v44  ;;  %v1483_v16 = vrot.slane %v1469_v50, %v6067_v44 }
 0x231   :  { %v1732_v3 = vrot.slane %v5328_v7, %v6067_v44  ;;  %v1748_v35 = vrot.slane %v5330_v4, %v6067_v44  ;;  %v1958_v36 = vcombine.low %v6496_v33, %v6499_v55  ;;  %v1959_v37 = vcombine.high %v6496_v33, %v6499_v55 }
 0x232   :  { %v1516_v38 = vcombine.low %v1460_v46, %v1476_v15  ;;  %v1517_v39 = vcombine.high %v1460_v46, %v1476_v15  ;;  %v1532_v40 = vcombine.low %v1467_v21, %v1483_v16  ;;  %v1533_v10 = vcombine.high %v1467_v21, %v1483_v16 }
 0x233   :  { %v1756_v41 = vcombine.low %v1700_v31, %v1716_v34  ;;  %v1788_v42 = vcombine.low %v1732_v3, %v1748_v35  ;;  %v1757_v45 = vcombine.high %v1700_v31, %v1716_v34  ;;  %v1789_v51 = vcombine.high %v1732_v3, %v1748_v35 }
 0x234   :  { %v1524_v0 = vrot.slane %v1516_v38, %v6075_v56  ;;  %v1531_v13 = vrot.slane %v1517_v39, %v6075_v56  ;;  %v1540_v58 = vrot.slane %v1532_v40, %v6075_v56  ;;  %v1547_v63 = vrot.slane %v1533_v10, %v6075_v56 }
 0x235   :  { %v1764_v11 = vrot.slane %v1756_v41, %v6075_v56  ;;  %v1796_v53 = vrot.slane %v1788_v42, %v6075_v56  ;;  %v6520_v9 = vrot.slane %v1757_v45, %v6075_v56  ;;  %v6523_v62 = vrot.slane %v1789_v51, %v6075_v56 }
 0x236   :  { %v5325_v17 = vcombine.low %v1524_v0, %v1531_v13  ;;  %v5327_v28 = vcombine.high %v1524_v0, %v1531_v13  ;;  %v5329_v57 = vcombine.low %v1540_v58, %v1547_v63  ;;  %v5331_v14 = vcombine.high %v1540_v58, %v1547_v63 }
 0x237   :  { %v1820_v23 = vcombine.low %v1764_v11, %v1796_v53  ;;  %v1821_v61 = vcombine.high %v1764_v11, %v1796_v53  ;;  %v1822_v48 = vcombine.low %v6520_v9, %v6523_v62  ;;  %v1823_v5 = vcombine.high %v6520_v9, %v6523_v62 }
 0x238   :  { %v1707_v12 = vrot.slane %v5325_v17, %v6067_v44  ;;  %v1723_v2 = vrot.slane %v5327_v28, %v6067_v44  ;;  %v1739_v60 = vrot.slane %v5329_v57, %v6067_v44  ;;  %v1755_v47 = vrot.slane %v5331_v14, %v6067_v44 }
 0x239   :  { %5575 = vmatpush3.msra.mxu0 %v1820_v23  ;;  %5580 = vmatpush3.msra.mxu1 %v1821_v61 }
 0x23a   :  { %5584 = vmatprep.subr.mxu0 %v5876_v18  ;;  %5589 = vmatprep.subr.mxu1 %v5876_v18  ;;  %v1772_v6 = vcombine.low %v1707_v12, %v1723_v2  ;;  %v1804_v54 = vcombine.low %v1739_v60, %v1755_v47  ;;  %v1773_v8 = vcombine.high %v1707_v12, %v1723_v2 }
 0x23b   :  { %v1805_v46 = vcombine.high %v1739_v60, %v1755_v47 }
 0x23c   :  { %v6536_v43 = vrot.slane %v1772_v6, %v6075_v56  ;;  %v6539_v19 = vrot.slane %v1804_v54, %v6075_v56  ;;  %v6542_v20 = vrot.slane %v1773_v8, %v6075_v56 }
 0x23d   :  { %v6545_v21 = vrot.slane %v1805_v46, %v6075_v56 }
 0x23e   :  { %v1824_v32 = vcombine.low %v6536_v43, %v6539_v19  ;;  %v1825_v22 = vcombine.high %v6536_v43, %v6539_v19 }
 0x23f   :  { %v1826_v29 = vcombine.low %v6542_v20, %v6545_v21  ;;  %v1827_v49 = vcombine.high %v6542_v20, %v6545_v21 }
 0x2b4   :  { %v6555_v50 = vpop.f32.mrf.mxu1 }
 0x2b5   :  { %3182 = vst.msk [vmem:[#allocation9] sm:$0xff] %vm3181_vm3, %v6555_v50  ;;  %v3198_v7 = vsel %vm3181_vm3, %v6555_v50, -inf }
 0x2b6   :  { %3199 = vmax.xlane.f32.xlu0 %v3198_v7  ;;  %v5498_v4 = vpop.f32.mrf.mxu1 }
 0x2b8   :  { %v6561_v31 = vpop.f32.mrf.mxu1 }
 0x2b9   :  { %3183 = vst.msk [vmem:[#allocation9 + $0x8] sm:$0xff] %vm3181_vm3, %v6561_v31  ;;  %v3201_v0 = vsel %vm3181_vm3, %v6561_v31, -inf }
 0x2ba   :  { %v5503_v34 = vpop.f32.mrf.mxu1 }
 0x2bc   :  { %v6565_v15 = vpop.f32.mrf.mxu1 }
 0x2bd   :  { %3184 = vst.msk [vmem:[#allocation9 + $0x10] sm:$0xff] %vm3181_vm3, %v6565_v15  ;;  %v3204_v16 = vsel %vm3181_vm3, %v6565_v15, -inf }
 0x2be   :  { %3205 = vmax.xlane.f32.xlu0 %v3204_v16  ;;  %v5508_v3 = vpop.f32.mrf.mxu1 }
 0x2c0   :  { %v6571_v35 = vpop.f32.mrf.mxu1 }
 0x2c1   :  { %3185 = vst.msk [vmem:[#allocation9 + $0x18] sm:$0xff] %vm3181_vm3, %v6571_v35  ;;  %v3207_v38 = vsel %vm3181_vm3, %v6571_v35, -inf }
 0x2c2   :  { %3208 = vmax.xlane.f32.xlu0 %v3207_v38  ;;  %v5513_v39 = vpop.f32.mrf.mxu1 }
 0x2cf   :  { %v6577_v40 = vpop.f32.mrf.mxu0 }
 0x2d0   :  { %3186 = vst.msk [vmem:[#allocation9 + $0x20] sm:$0xff] %vm3181_vm3, %v6577_v40  ;;  %v6581_v10 = vpop.f32.mrf.mxu1  ;;  %v3210_v41 = vsel %vm3181_vm3, %v6577_v40, -inf }
 0x2d1   :  { %3187 = vst.msk [vmem:[#allocation9 + $0x28] sm:$0xff] %vm3181_vm3, %v6581_v10  ;;  %v3213_v42 = vsel %vm3181_vm3, %v6581_v10, -inf  ;;  %3211 = vmax.xlane.f32.xlu1 %v3210_v41  ;;  %v5518_v45 = vpop.f32.mrf.mxu0 }
 0x2d2   :  { %3214 = vmax.xlane.f32.xlu0 %v3213_v42  ;;  %v5523_v51 = vpop.f32.mrf.mxu1 }
 0x2d5   :  { %3202 = vmax.xlane.f32.xlu1 %v3201_v0 }
 0x2d8   :  { %v6591_v13 = vpop.f32.mrf.mxu0 }
 0x2d9   :  { %3188 = vst.msk [vmem:[#allocation9 + $0x30] sm:$0xff] %vm3181_vm3, %v6591_v13  ;;  %v6595_v58 = vpop.f32.mrf.mxu1  ;;  %v3216_v63 = vsel %vm3181_vm3, %v6591_v13, -inf }
 0x2da   :  { %3189 = vst.msk [vmem:[#allocation9 + $0x38] sm:$0xff] %vm3181_vm3, %v6595_v58  ;;  %v3219_v11 = vsel %vm3181_vm3, %v6595_v58, -inf  ;;  %v5528_v53 = vpop.f32.mrf.mxu0  ;;  %3217 = vmax.xlane.f32.xlu1 %v3216_v63 }
 0x2db   :  { %3220 = vmax.xlane.f32.xlu0 %v3219_v11  ;;  %v5533_v17 = vpop.f32.mrf.mxu1 }
 0x2dc   :  { %v6603_v28 = vpop.f32.mrf.mxu0 }
 0x2dd   :  { %3190 = vst.msk [vmem:[#allocation9 + $0x40] sm:$0xff] %vm3181_vm3, %v6603_v28  ;;  %v6607_v57 = vpop.f32.mrf.mxu1  ;;  %v3222_v14 = vsel %vm3181_vm3, %v6603_v28, -inf }
 0x2de   :  { %3191 = vst.msk [vmem:[#allocation9 + $0x48] sm:$0xff] %vm3181_vm3, %v6607_v57  ;;  %v3225_v23 = vsel %vm3181_vm3, %v6607_v57, -inf  ;;  %v5538_v61 = vpop.f32.mrf.mxu0  ;;  %3223 = vmax.xlane.f32.xlu1 %v3222_v14 }
 0x2df   :  { %3226 = vmax.xlane.f32.xlu0 %v3225_v23  ;;  %v5543_v12 = vpop.f32.mrf.mxu1 }
 0x2e0   :  { %v6615_v2 = vpop.f32.mrf.mxu0 }
 0x2e1   :  { %3192 = vst.msk [vmem:[#allocation9 + $0x50] sm:$0xff] %vm3181_vm3, %v6615_v2  ;;  %v6619_v60 = vpop.f32.mrf.mxu1  ;;  %v3228_v47 = vsel %vm3181_vm3, %v6615_v2, -inf }
 0x2e2   :  { %3193 = vst.msk [vmem:[#allocation9 + $0x58] sm:$0xff] %vm3181_vm3, %v6619_v60  ;;  %v3231_v6 = vsel %vm3181_vm3, %v6619_v60, -inf  ;;  %v5548_v54 = vpop.f32.mrf.mxu0  ;;  %3229 = vmax.xlane.f32.xlu1 %v3228_v47 }
 0x2e3   :  { %3232 = vmax.xlane.f32.xlu0 %v3231_v6  ;;  %v5553_v8 = vpop.f32.mrf.mxu1 }
 0x2e4   :  { %v6627_v46 = vpop.f32.mrf.mxu0 }
 0x2e5   :  { %3194 = vst.msk [vmem:[#allocation9 + $0x60] sm:$0xff] %vm3181_vm3, %v6627_v46  ;;  %v6631_v7 = vpop.f32.mrf.mxu1  ;;  %v3234_v4 = vsel %vm3181_vm3, %v6627_v46, -inf }
 0x2e6   :  { %3195 = vst.msk [vmem:[#allocation9 + $0x68] sm:$0xff] %vm3181_vm3, %v6631_v7  ;;  %v3237_v34 = vsel %vm3181_vm3, %v6631_v7, -inf  ;;  %v5558_v16 = vpop.f32.mrf.mxu0  ;;  %3235 = vmax.xlane.f32.xlu1 %v3234_v4 }
 0x2e7   :  { %3238 = vmax.xlane.f32.xlu0 %v3237_v34  ;;  %v5563_v3 = vpop.f32.mrf.mxu1 }
 0x2ea   :  { %v6639_v38 = vpop.f32.mrf.mxu0  ;;  %v6641_v39 = vpop.f32.mrf.mxu1 }
 0x2eb   :  { %3196 = vst.msk [vmem:[#allocation9 + $0x70] sm:$0xff] %vm3181_vm3, %v6639_v38  ;;  %3197 = vst.msk [vmem:[#allocation9 + $0x78] sm:$0xff] %vm3181_vm3, %v6641_v39  ;;  %v3243_v41 = vsel %vm3181_vm3, %v6641_v39, -inf  ;;  %v3240_v42 = vsel %vm3181_vm3, %v6639_v38, -inf }
 0x2ec   :  { %3244 = vmax.xlane.f32.xlu0 %v3243_v41  ;;  %v5568_v45 = vpop.f32.mrf.mxu0  ;;  %v5573_v51 = vpop.f32.mrf.mxu1  ;;  %3241 = vmax.xlane.f32.xlu1 %v3240_v42 }
 0x2fd   :  { %1394 = vrot.lane.b32.xlu1 %v6029_v25, %s5878_s20 }
 0x302   :  { %1390 = vrot.lane.b32.xlu0 %v6023_v24, %s5878_s20 }
 0x33f   :  { %v3200_v0 = vpop.xlane.xlu0 %3199 }
 0x340   :  { %v3246_v63 = vsub.f32 %v6555_v50, %v3200_v0 }
 0x342   :  { %v3262_v11 = vmul.f32 1.442695, %v3246_v63 }
 0x344   :  { %5691 = vpow2.f32 %v3262_v11 }
 0x347   :  { %v3206_v14 = vpop.xlane.xlu0 %3205 }
 0x348   :  { %v3248_v23 = vsub.f32 %v6565_v15, %v3206_v14 }
 0x34a   :  { %v3266_v47 = vmul.f32 1.442695, %v3248_v23 }
 0x34b   :  { %v3209_v61 = vpop.xlane.xlu0 %3208 }
 0x34c   :  { %v3249_v3 = vsub.f32 %v6571_v35, %v3209_v61 }
 0x351   :  { %v6656_v53 = vpop.eup %5691 }
 0x352   :  { %v3294_v17 = vsel %vm3181_vm3, %v6656_v53, 0.0 }
 0x353   :  { %3295 = vadd.xlane.f32.xlu1 %v3294_v17 }
 0x35a   :  { %v3212_v12 = vpop.xlane.xlu1 %3211 }
 0x35b   :  { %v3250_v25 = vsub.f32 %v6577_v40, %v3212_v12  ;;  %v3215_v6 = vpop.xlane.xlu0 %3214 }
 0x35d   :  { %v3270_v24 = vmul.f32 1.442695, %v3250_v25 }
 0x35e   :  { %v3203_v54 = vpop.xlane.xlu1 %3202 }
 0x35f   :  { %5693 = vpow2.f32 %v3270_v24  ;;  %v3247_v50 = vsub.f32 %v6561_v31, %v3203_v54  ;;  %v3268_v31 = vmul.f32 1.442695, %v3249_v3 }
 0x360   :  { %5695 = vpow2.f32 %v3266_v47 }
 0x361   :  { %v3264_v8 = vmul.f32 1.442695, %v3247_v50 }
 0x363   :  { %5697 = vpow2.f32 %v3264_v8  ;;  %v3218_v4 = vpop.xlane.xlu1 %3217 }
 0x364   :  { %v3221_v34 = vpop.xlane.xlu0 %3220  ;;  %v3252_v16 = vsub.f32 %v6591_v13, %v3218_v4 }
 0x365   :  { %v3253_v15 = vsub.f32 %v6595_v58, %v3221_v34 }
 0x366   :  { %v3274_v41 = vmul.f32 1.442695, %v3252_v16 }
 0x367   :  { %v3276_v40 = vmul.f32 1.442695, %v3253_v15  ;;  %v3224_v42 = vpop.xlane.xlu1 %3223 }
 0x368   :  { %5699 = vpow2.f32 %v3274_v41  ;;  %v3227_v45 = vpop.xlane.xlu0 %3226  ;;  %v3254_v51 = vsub.f32 %v6603_v28, %v3224_v42  ;;  %v3251_v28 = vsub.f32 %v6581_v10, %v3215_v6 }
 0x369   :  { %5701 = vpow2.f32 %v3276_v40  ;;  %v3255_v40 = vsub.f32 %v6607_v57, %v3227_v45 }
 0x36a   :  { %v3278_v0 = vmul.f32 1.442695, %v3254_v51  ;;  %v3272_v54 = vmul.f32 1.442695, %v3251_v28 }
 0x36b   :  { %v3230_v63 = vpop.xlane.xlu1 %3229 }
 0x36c   :  { %v6667_v11 = vpop.eup %5693  ;;  %5703 = vpow2.f32 %v3278_v0  ;;  %v3233_v17 = vpop.xlane.xlu0 %3232  ;;  %v3256_v13 = vsub.f32 %v6615_v2, %v3230_v63 }
 0x36d   :  { %v3257_v58 = vsub.f32 %v6619_v60, %v3233_v17  ;;  %v3306_v35 = vsel %vm3181_vm3, %v6667_v11, 0.0  ;;  %v6673_v14 = vpop.eup %5695  ;;  %5705 = vpow2.f32 %v3268_v31  ;;  %v3280_v31 = vmul.f32 1.442695, %v3255_v40 }
 0x36e   :  { %v3282_v23 = vmul.f32 1.442695, %v3256_v13  ;;  %3307 = vadd.xlane.f32.xlu1 %v3306_v35  ;;  %v3300_v24 = vsel %vm3181_vm3, %v6673_v14, 0.0 }
 0x36f   :  { %v3284_v61 = vmul.f32 1.442695, %v3257_v58  ;;  %v3236_v12 = vpop.xlane.xlu1 %3235 }
 0x370   :  { %v6676_v25 = vpop.eup %5697  ;;  %v3239_v47 = vpop.xlane.xlu0 %3238  ;;  %v3258_v2 = vsub.f32 %v6627_v46, %v3236_v12 }
 0x371   :  { %5707 = vpow2.f32 %v3284_v61  ;;  %v3297_v60 = vsel %vm3181_vm3, %v6676_v25, 0.0  ;;  %v3259_v0 = vsub.f32 %v6631_v7, %v3239_v47 }
 0x372   :  { %5709 = vpow2.f32 %v3282_v23  ;;  %3298 = vadd.xlane.f32.xlu0 %v3297_v60  ;;  %3301 = vadd.xlane.f32.xlu1 %v3300_v24  ;;  %v3286_v6 = vmul.f32 1.442695, %v3258_v2 }
 0x373   :  { %5711 = vpow2.f32 %v3272_v54  ;;  %v3288_v45 = vmul.f32 1.442695, %v3259_v0 }
 0x374   :  { %5713 = vpow2.f32 %v3286_v6 }
 0x375   :  { %v6683_v10 = vpop.eup %5699  ;;  %v3245_v50 = vpop.xlane.xlu0 %3244 }
 0x376   :  { %v3242_v8 = vpop.xlane.xlu1 %3241  ;;  %v6685_v4 = vpop.eup %5701  ;;  %v3261_v46 = vsub.f32 %v6641_v39, %v3245_v50  ;;  %v3312_v16 = vsel %vm3181_vm3, %v6683_v10, 0.0 }
 0x377   :  { %v3260_v34 = vsub.f32 %v6639_v38, %v3242_v8  ;;  %3313 = vadd.xlane.f32.xlu0 %v3312_v16  ;;  %v3315_v15 = vsel %vm3181_vm3, %v6685_v4, 0.0 }
 0x378   :  { %v3292_v3 = vmul.f32 1.442695, %v3261_v46  ;;  %3316 = vadd.xlane.f32.xlu1 %v3315_v15 }
 0x379   :  { %v6693_v41 = vpop.eup %5703  ;;  %v3290_v42 = vmul.f32 1.442695, %v3260_v34 }
 0x37a   :  { %5715 = vpow2.f32 %v3292_v3  ;;  %v3318_v39 = vsel %vm3181_vm3, %v6693_v41, 0.0  ;;  %v6698_v38 = vpop.eup %5705  ;;  %v6739_v6 = vpop.permute.xlu1 %1394 }
 0x37b   :  { %3319 = vadd.xlane.f32.xlu0 %v3318_v39  ;;  %5717 = vpow2.f32 %v3290_v42  ;;  %v3303_v63 = vsel %vm3181_vm3, %v6698_v38, 0.0 }
 0x37c   :  { %5719 = vpow2.f32 %v3280_v31 }
 0x37d   :  { %5721 = vpow2.f32 %v3288_v45 }
 0x37e   :  { %v6700_v51 = vpop.eup %5707 }
 0x37f   :  { %v6705_v17 = vpop.eup %5709  ;;  %v3327_v57 = vsel %vm3181_vm3, %v6700_v51, 0.0  ;;  %3304 = vadd.xlane.f32.xlu0 %v3303_v63 }
 0x380   :  { %3328 = vadd.xlane.f32.xlu1 %v3327_v57  ;;  %v3324_v13 = vsel %vm3181_vm3, %v6705_v17, 0.0  ;;  %v6711_v58 = vpop.eup %5711 }
 0x381   :  { %v6713_v7 = vpop.eup %5713  ;;  %v3309_v35 = vsel %vm3181_vm3, %v6711_v58, 0.0 }
 0x382   :  { %v3330_v61 = vsel %vm3181_vm3, %v6713_v7, 0.0 }
 0x383   :  { %3325 = vadd.xlane.f32.xlu0 %v3324_v13 }
 0x387   :  { %v6717_v28 = vpop.eup %5715  ;;  %3310 = vadd.xlane.f32.xlu0 %v3309_v35 }
 0x388   :  { %v3339_v23 = vsel %vm3181_vm3, %v6717_v28, 0.0  ;;  %v6723_v12 = vpop.eup %5717 }
 0x389   :  { %3340 = vadd.xlane.f32.xlu1 %v3339_v23  ;;  %v3336_v47 = vsel %vm3181_vm3, %v6723_v12, 0.0  ;;  %v6727_v2 = vpop.eup %5719 }
 0x38a   :  { %v3321_v60 = vsel %vm3181_vm3, %v6727_v2, 0.0  ;;  %v6731_v24 = vpop.eup %5721 }
 0x38b   :  { %3331 = vadd.xlane.f32.xlu0 %v3330_v61  ;;  %v3333_v54 = vsel %vm3181_vm3, %v6731_v24, 0.0 }
 0x38f   :  { %3337 = vadd.xlane.f32.xlu0 %v3336_v47 }
 0x393   :  { %3322 = vadd.xlane.f32.xlu0 %v3321_v60 }
 0x397   :  { %3334 = vadd.xlane.f32.xlu0 %v3333_v54 }
 0x39a   :  { %1402 = vrot.lane.b32.xlu1 %v6037_v27, %s5878_s20  ;;  %v6749_v27 = vpop.permute.xlu0 %1390 }
 0x3ad   :  { %1398 = vrot.lane.b32.xlu0 %v6031_v26, %s5878_s20 }
 0x3dc   :  { %v3296_v50 = vpop.xlane.xlu1 %3295 }
 0x3dd   :  { %5723 = vrcp.f32 %v3296_v50 }
 0x3ea   :  { %v5724_v8 = vpop.eup %5723 }
 0x3eb   :  { %v3343_v46 = vmul.f32 %v5724_v8, %v6656_v53 }
 0x3ed   :  { %5577 = vmatmul.mubr.msk.f32.vlgmr.msra.gmra.mxu0 %vm3181_vm3, %v3343_v46 }
 0x3ee   :  { %5585 = vmatpush3.msra.mxu0 %v1822_v48  ;;  %5586 = vmatprep.mubr.msk.f32.mxu0 %vm5877_vm1, %v5876_v18 }
 0x3ef   :  { %5594 = vmatprep.subr.mxu0 %v5876_v18 }
 0x3f7   :  { %v3308_v26 = vpop.xlane.xlu1 %3307 }
 0x3fb   :  { %v3302_v34 = vpop.xlane.xlu1 %3301  ;;  %v3299_v16 = vpop.xlane.xlu0 %3298 }
 0x3fc   :  { %5725 = vrcp.f32 %v3302_v34 }
 0x3fd   :  { %5727 = vrcp.f32 %v3299_v16 }
 0x3fe   :  { %5729 = vrcp.f32 %v3308_v26 }
 0x400   :  { %v3314_v53 = vpop.xlane.xlu0 %3313 }
 0x401   :  { %5731 = vrcp.f32 %v3314_v53  ;;  %v3317_v63 = vpop.xlane.xlu1 %3316 }
 0x404   :  { %v3320_v15 = vpop.xlane.xlu0 %3319 }
 0x405   :  { %5733 = vrcp.f32 %v3320_v15 }
 0x408   :  { %v3305_v3 = vpop.xlane.xlu0 %3304 }
 0x409   :  { %v5726_v40 = vpop.eup %5725  ;;  %5735 = vrcp.f32 %v3305_v3 }
 0x40a   :  { %v5728_v48 = vpop.eup %5727  ;;  %v3347_v42 = vmul.f32 %v5726_v40, %v6673_v14 }
 0x40b   :  { %v5730_v39 = vpop.eup %5729  ;;  %v3345_v31 = vmul.f32 %v5728_v48, %v6676_v25 }
 0x40c   :  { %v3326_v0 = vpop.xlane.xlu0 %3325  ;;  %5587 = vmatmul.mubr.msk.f32.vlgmr.msra.gmra.mxu0 %vm3181_vm3, %v3347_v42  ;;  %v3351_v14 = vmul.f32 %v5730_v39, %v6667_v11 }
 0x40d   :  { %5737 = vrcp.f32 %v3326_v0  ;;  %5595 = vmatpush3.msra.mxu0 %v1824_v32  ;;  %5582 = vmatmul.mubr.msk.f32.vlgmr.msra.gmra.mxu1 %vm3181_vm3, %v3345_v31 }
 0x40e   :  { %5590 = vmatpush3.msra.mxu1 %v1823_v5  ;;  %5596 = vmatprep.mubr.msk.f32.mxu0 %vm5877_vm1, %v5876_v18  ;;  %v5732_v25 = vpop.eup %5731 }
 0x40f   :  { %5604 = vmatprep.subr.mxu0 %v5876_v18  ;;  %5591 = vmatprep.mubr.msk.f32.mxu1 %vm5877_vm1, %v5876_v18  ;;  %v3355_v9 = vmul.f32 %v5732_v25, %v6683_v10 }
 0x410   :  { %v3311_v57 = vpop.xlane.xlu0 %3310  ;;  %5597 = vmatmul.mubr.msk.f32.vlgmr.msra.gmra.mxu0 %vm3181_vm3, %v3351_v14  ;;  %5599 = vmatprep.subr.mxu1 %v5876_v18 }
 0x411   :  { %5739 = vrcp.f32 %v3311_v57  ;;  %5605 = vmatpush3.msra.mxu0 %v1826_v29  ;;  %5606 = vmatprep.mubr.msk.f32.mxu0 %vm5877_vm1, %v5876_v18  ;;  %v3329_v29 = vpop.xlane.xlu1 %3328 }
 0x412   :  { %5614 = vmatprep.subr.mxu0 %v5876_v18  ;;  %v5734_v62 = vpop.eup %5733  ;;  %5741 = vrcp.f32 %v3317_v63 }
 0x413   :  { %v3359_v11 = vmul.f32 %v5734_v62, %v6693_v41 }
 0x414   :  { %v3332_v5 = vpop.xlane.xlu0 %3331  ;;  %5607 = vmatmul.mubr.msk.f32.vlgmr.msra.gmra.mxu0 %vm3181_vm3, %v3355_v9 }
 0x415   :  { %5615 = vmatpush3.msra.mxu0 %v1956_v30  ;;  %5616 = vmatprep.mubr.msk.f32.mxu0 %vm5877_vm1, %v5876_v18  ;;  %v3341_v13 = vpop.xlane.xlu1 %3340 }
 0x416   :  { %v5736_v32 = vpop.eup %5735  ;;  %5624 = vmatprep.subr.mxu0 %v5876_v18 }
 0x417   :  { %v3349_v10 = vmul.f32 %v5736_v32, %v6698_v38 }
 0x418   :  { %v3338_v45 = vpop.xlane.xlu0 %3337  ;;  %5617 = vmatmul.mubr.msk.f32.vlgmr.msra.gmra.mxu0 %vm3181_vm3, %v3359_v11 }
 0x419   :  { %5592 = vmatmul.mubr.msk.f32.vlgmr.msra.gmra.mxu1 %vm3181_vm3, %v3349_v10  ;;  %5625 = vmatpush3.msra.mxu0 %v1958_v36 }
 0x41a   :  { %v5738_v30 = vpop.eup %5737  ;;  %5600 = vmatpush3.msra.mxu1 %v1825_v22  ;;  %5626 = vmatprep.mubr.msk.f32.mxu0 %vm5877_vm1, %v5876_v18  ;;  %v1403_v22 = vpop.permute.xlu1 %1402 }
 0x41b   :  { %v3363_v41 = vmul.f32 %v5738_v30, %v6705_v17  ;;  %5601 = vmatprep.mubr.msk.f32.mxu1 %vm5877_vm1, %v5876_v18  ;;  %5609 = vmatprep.subr.mxu1 %v5876_v18  ;;  %v1604_v35 = vcombine.low %v6739_v6, %v1403_v22  ;;  %v1605_v23 = vcombine.high %v6739_v6, %v1403_v22 }
 0x41c   :  { %v3323_v38 = vpop.xlane.xlu0 %3322  ;;  %5634 = vmatprep.subr.mxu0 %v5876_v18 }
 0x41d   :  { %5743 = vrcp.f32 %v3323_v38  ;;  %5627 = vmatmul.mubr.msk.f32.vlgmr.msra.gmra.mxu0 %vm3181_vm3, %v3363_v41  ;;  %v1612_v20 = vrot.slane %v1604_v35, %v6067_v44  ;;  %v1619_v21 = vrot.slane %v1605_v23, %v6067_v44 }
 0x41e   :  { %v5740_v36 = vpop.eup %5739  ;;  %5636 = vmatprep.mubr.msk.f32.mxu0 %vm5877_vm1, %v5876_v18  ;;  %5745 = vrcp.f32 %v3329_v29 }
 0x41f   :  { %v3353_v43 = vmul.f32 %v5740_v36, %v6711_v58  ;;  %v5742_v19 = vpop.eup %5741  ;;  %5747 = vrcp.f32 %v3332_v5 }
 0x420   :  { %v3335_v17 = vpop.xlane.xlu0 %3334  ;;  %v3357_v58 = vmul.f32 %v5742_v19, %v6685_v4 }
 0x421   :  { %5602 = vmatmul.mubr.msk.f32.vlgmr.msra.gmra.mxu1 %vm3181_vm3, %v3353_v43  ;;  %5749 = vrcp.f32 %v3335_v17 }
 0x422   :  { %5610 = vmatpush3.msra.mxu1 %v1827_v49  ;;  %5611 = vmatprep.mubr.msk.f32.mxu1 %vm5877_vm1, %v5876_v18  ;;  %5751 = vrcp.f32 %v3341_v13 }
 0x423   :  { %5619 = vmatprep.subr.mxu1 %v5876_v18  ;;  %5753 = vrcp.f32 %v3338_v45 }
 0x424   :  { %v1399_v61 = vpop.permute.xlu0 %1398 }
 0x425   :  { %v1588_v47 = vcombine.low %v6749_v27, %v1399_v61  ;;  %v1589_v60 = vcombine.high %v6749_v27, %v1399_v61  ;;  %5612 = vmatmul.mubr.msk.f32.vlgmr.msra.gmra.mxu1 %vm3181_vm3, %v3357_v58 }
 0x426   :  { %5620 = vmatpush3.msra.mxu1 %v1957_v52  ;;  %5621 = vmatprep.mubr.msk.f32.mxu1 %vm5877_vm1, %v5876_v18 }
 0x427   :  { %v1596_v49 = vrot.slane %v1588_v47, %v6067_v44  ;;  %v1603_v4 = vrot.slane %v1589_v60, %v6067_v44  ;;  %5629 = vmatprep.subr.mxu1 %v5876_v18 }
 0x429   :  { %v1652_v54 = vcombine.low %v1596_v49, %v1612_v20  ;;  %v1653_v6 = vcombine.high %v1596_v49, %v1612_v20  ;;  %v1668_v50 = vcombine.low %v1603_v4, %v1619_v21  ;;  %v1669_v8 = vcombine.high %v1603_v4, %v1619_v21 }
 0x42a   :  { %v5744_v59 = vpop.eup %5743 }
 0x42b   :  { %v1660_v1 = vrot.slane %v1652_v54, %v6075_v56  ;;  %v1667_v52 = vrot.slane %v1653_v6, %v6075_v56  ;;  %v1676_v46 = vrot.slane %v1668_v50, %v6075_v56  ;;  %v1683_v27 = vrot.slane %v1669_v8, %v6075_v56  ;;  %v5746_v34 = vpop.eup %5745 }
 0x42c   :  { %v3361_v26 = vmul.f32 %v5744_v59, %v6727_v2  ;;  %v3365_v2 = vmul.f32 %v5746_v34, %v6700_v51  ;;  %v5748_v63 = vpop.eup %5747 }
 0x42d   :  { %v5333_v16 = vcombine.low %v1660_v1, %v1667_v52  ;;  %v5335_v53 = vcombine.high %v1660_v1, %v1667_v52  ;;  %v5337_v15 = vcombine.low %v1676_v46, %v1683_v27  ;;  %v5339_v3 = vcombine.high %v1676_v46, %v1683_v27 }
 0x42e   :  { %5622 = vmatmul.mubr.msk.f32.vlgmr.msra.gmra.mxu1 %vm3181_vm3, %v3361_v26  ;;  %v5750_v57 = vpop.eup %5749  ;;  %v3367_v32 = vmul.f32 %v5748_v63, %v6713_v7 }
 0x42f   :  { %v1843_v40 = vrot.slane %v5333_v16, %v6067_v44  ;;  %v1859_v48 = vrot.slane %v5335_v53, %v6067_v44  ;;  %v1875_v42 = vrot.slane %v5337_v15, %v6067_v44  ;;  %v1891_v39 = vrot.slane %v5339_v3, %v6067_v44  ;;  %5630 = vmatpush3.msra.mxu1 %v1959_v37  ;;  %v5752_v51 = vpop.eup %5751 }
 0x430   :  { %5631 = vmatprep.mubr.msk.f32.mxu1 %vm5877_vm1, %v5876_v18  ;;  %5639 = vmatprep.subr.mxu1 %v5876_v18  ;;  %v3369_v29 = vmul.f32 %v5750_v57, %v6731_v24  ;;  %v5754_v11 = vpop.eup %5753  ;;  %v3373_v7 = vmul.f32 %v5752_v51, %v6717_v28 }
 0x431   :  { %v1908_v31 = vcombine.low %v1843_v40, %v1859_v48  ;;  %v1940_v0 = vcombine.low %v1875_v42, %v1891_v39  ;;  %v1909_v14 = vcombine.high %v1843_v40, %v1859_v48  ;;  %v1941_v25 = vcombine.high %v1875_v42, %v1891_v39 }
 0x432   :  { %5632 = vmatmul.mubr.msk.f32.vlgmr.msra.gmra.mxu1 %vm3181_vm3, %v3365_v2  ;;  %v3371_v30 = vmul.f32 %v5754_v11, %v6723_v12 }
 0x433   :  { %v1916_v9 = vrot.slane %v1908_v31, %v6075_v56  ;;  %v1948_v33 = vrot.slane %v1940_v0, %v6075_v56  ;;  %5641 = vmatprep.mubr.msk.f32.mxu1 %vm5877_vm1, %v5876_v18  ;;  %v1923_v55 = vrot.slane %v1909_v14, %v6075_v56  ;;  %v1955_v37 = vrot.slane %v1941_v25, %v6075_v56 }
 0x435   :  { %v1960_v62 = vcombine.low %v1916_v9, %v1948_v33  ;;  %v1961_v5 = vcombine.high %v1916_v9, %v1948_v33  ;;  %v1962_v10 = vcombine.low %v1923_v55, %v1955_v37  ;;  %v1963_v45 = vcombine.high %v1923_v55, %v1955_v37 }
 0x437   :  { %5635 = vmatpush3.msra.mxu0 %v1960_v62  ;;  %5640 = vmatpush3.msra.mxu1 %v1961_v5 }
 0x438   :  { %5637 = vmatmul.mubr.msk.f32.vlgmr.msra.gmra.mxu0 %vm3181_vm3, %v3367_v32  ;;  %5642 = vmatmul.mubr.msk.f32.vlgmr.msra.gmra.mxu1 %vm3181_vm3, %v3369_v29 }
 0x439   :  { %5644 = vmatprep.subr.mxu0 %v5876_v18  ;;  %5649 = vmatprep.subr.mxu1 %v5876_v18 }
 0x43a   :  { %5645 = vmatpush3.msra.mxu0 %v1962_v10  ;;  %5650 = vmatpush3.msra.mxu1 %v1963_v45 }
 0x43b   :  { %5646 = vmatprep.mubr.msk.f32.mxu0 %vm5877_vm1, %v5876_v18  ;;  %5651 = vmatprep.mubr.msk.f32.mxu1 %vm5877_vm1, %v5876_v18 }
 0x43c   :  { %5647 = vmatmul.mubr.msk.f32.vlgmr.msra.gmra.mxu0 %vm3181_vm3, %v3371_v30  ;;  %5652 = vmatmul.mubr.msk.f32.vlgmr.msra.gmra.mxu1 %vm3181_vm3, %v3373_v7 }
 0x4ad   :  { %v3443_v24 = vpop.f32.mrf.mxu0 }
 0x4af   :  { %v5578_v13 = vpop.f32.mrf.mxu0 }
 0x4cc   :  { %v3589_v41 = vpop.f32.mrf.mxu0 }
 0x4cd   :  { %v3516_v38 = vpop.f32.mrf.mxu1  ;;  %v4542_v17 = vcombine.low %v3443_v24, %v3589_v41  ;;  %v4543_v35 = vcombine.high %v3443_v24, %v3589_v41 }
 0x4ce   :  { %v5588_v36 = vpop.f32.mrf.mxu0 }
 0x4cf   :  { %v5583_v43 = vpop.f32.mrf.mxu1  ;;  %v4550_v20 = vrot.slane %v4542_v17, %v6067_v44  ;;  %v4557_v21 = vrot.slane %v4543_v35, %v6067_v44 }
 0x4d0   :  { %v3735_v19 = vpop.f32.mrf.mxu0 }
 0x4d2   :  { %v5598_v12 = vpop.f32.mrf.mxu0 }
 0x4d4   :  { %v3881_v22 = vpop.f32.mrf.mxu0 }
 0x4d5   :  { %v4574_v40 = vcombine.low %v3735_v19, %v3881_v22  ;;  %v4575_v48 = vcombine.high %v3735_v19, %v3881_v22 }
 0x4d6   :  { %v5608_v28 = vpop.f32.mrf.mxu0 }
 0x4d7   :  { %v4582_v33 = vrot.slane %v4574_v40, %v6067_v44  ;;  %v4589_v55 = vrot.slane %v4575_v48, %v6067_v44 }
 0x4d8   :  { %v6865_v23 = vpop.f32.mrf.mxu0 }
 0x4d9   :  { %v3662_v58 = vpop.f32.mrf.mxu1 }
 0x4da   :  { %v4558_v18 = vcombine.low %v3516_v38, %v3662_v58  ;;  %v4559_v61 = vcombine.high %v3516_v38, %v3662_v58  ;;  %v5618_v47 = vpop.f32.mrf.mxu0 }
 0x4db   :  { %v5593_v60 = vpop.f32.mrf.mxu1 }
 0x4dc   :  { %v4566_v49 = vrot.slane %v4558_v18, %v6067_v44  ;;  %v4573_v4 = vrot.slane %v4559_v61, %v6067_v44 }
 0x4dd   :  { %v6871_v54 = vpop.f32.mrf.mxu0 }
 0x4de   :  { %v4606_v6 = vcombine.low %v4550_v20, %v4566_v49  ;;  %v4607_v50 = vcombine.high %v4550_v20, %v4566_v49  ;;  %v4622_v8 = vcombine.low %v4557_v21, %v4573_v4  ;;  %v4623_v59 = vcombine.high %v4557_v21, %v4573_v4 }
 0x4df   :  { %v5628_v1 = vpop.f32.mrf.mxu0  ;;  %v4678_v49 = vcombine.low %v6865_v23, %v6871_v54  ;;  %v4679_v4 = vcombine.high %v6865_v23, %v6871_v54 }
 0x4e0   :  { %v4614_v52 = vrot.slane %v4606_v6, %v6075_v56  ;;  %v4621_v46 = vrot.slane %v4607_v50, %v6075_v56  ;;  %v4630_v27 = vrot.slane %v4622_v8, %v6075_v56  ;;  %v4637_v26 = vrot.slane %v4623_v59, %v6075_v56 }
 0x4e1   :  { %v3808_v34 = vpop.f32.mrf.mxu1 }
 0x4e2   :  { %v5388_v16 = vcombine.low %v4614_v52, %v4621_v46  ;;  %v5390_v53 = vcombine.high %v4614_v52, %v4621_v46  ;;  %v5392_v15 = vcombine.low %v4630_v27, %v4637_v26  ;;  %v5394_v3 = vcombine.high %v4630_v27, %v4637_v26 }
 0x4e3   :  { %v5603_v42 = vpop.f32.mrf.mxu1 }
 0x4e4   :  { %v4822_v39 = vrot.slane %v5388_v16, %v6067_v44  ;;  %v4838_v2 = vrot.slane %v5390_v53, %v6067_v44  ;;  %v4854_v31 = vrot.slane %v5392_v15, %v6067_v44  ;;  %v4870_v0 = vrot.slane %v5394_v3, %v6067_v44 }
 0x4e5   :  { %v3954_v14 = vpop.f32.mrf.mxu1  ;;  %v4686_v53 = vrot.slane %v4678_v49, %v6067_v44  ;;  %v4693_v15 = vrot.slane %v4679_v4, %v6067_v44 }
 0x4e6   :  { %v4590_v25 = vcombine.low %v3808_v34, %v3954_v14  ;;  %v4591_v63 = vcombine.high %v3808_v34, %v3954_v14  ;;  %v4878_v57 = vcombine.low %v4822_v39, %v4838_v2  ;;  %v4910_v9 = vcombine.low %v4854_v31, %v4870_v0 }
 0x4e7   :  { %v5613_v37 = vpop.f32.mrf.mxu1  ;;  %v4879_v51 = vcombine.high %v4822_v39, %v4838_v2  ;;  %v4911_v62 = vcombine.high %v4854_v31, %v4870_v0 }
 0x4e8   :  { %v4598_v5 = vrot.slane %v4590_v25, %v6067_v44  ;;  %v4605_v32 = vrot.slane %v4591_v63, %v6067_v44  ;;  %v6886_v29 = vrot.slane %v4878_v57, %v6075_v56  ;;  %v6889_v11 = vrot.slane %v4910_v9, %v6075_v56 }
 0x4e9   :  { %v4893_v13 = vrot.slane %v4879_v51, %v6075_v56  ;;  %v4925_v41 = vrot.slane %v4911_v62, %v6075_v56 }
 0x4ea   :  { %v4638_v10 = vcombine.low %v4582_v33, %v4598_v5  ;;  %v4639_v45 = vcombine.high %v4582_v33, %v4598_v5  ;;  %v4654_v30 = vcombine.low %v4589_v55, %v4605_v32  ;;  %v4655_v7 = vcombine.high %v4589_v55, %v4605_v32 }
 0x4eb   :  { %v4943_v24 = vcombine.high %v6886_v29, %v6889_v11  ;;  %v4942_v38 = vcombine.low %v6886_v29, %v6889_v11  ;;  %v4944_v18 = vcombine.low %v4893_v13, %v4925_v41  ;;  %v4945_v52 = vcombine.high %v4893_v13, %v4925_v41 }
 0x4ec   :  { %v4646_v36 = vrot.slane %v4638_v10, %v6075_v56  ;;  %v4653_v43 = vrot.slane %v4639_v45, %v6075_v56  ;;  %v4662_v19 = vrot.slane %v4654_v30, %v6075_v56  ;;  %v4669_v12 = vrot.slane %v4655_v7, %v6075_v56 }
 0x4ed   :  { %5088 = vrot.lane.b32.xlu0 %v4943_v24, %s5881_s21 }
 0x4ee   :  { %v5389_v22 = vcombine.low %v4646_v36, %v4653_v43  ;;  %v5391_v28 = vcombine.high %v4646_v36, %v4653_v43  ;;  %v5393_v17 = vcombine.low %v4662_v19, %v4669_v12  ;;  %v5395_v35 = vcombine.high %v4662_v19, %v4669_v12  ;;  %v4100_v58 = vpop.f32.mrf.mxu1 }
 0x4f0   :  { %v4829_v61 = vrot.slane %v5389_v22, %v6067_v44  ;;  %v4845_v47 = vrot.slane %v5391_v28, %v6067_v44  ;;  %v4861_v60 = vrot.slane %v5393_v17, %v6067_v44  ;;  %v4877_v20 = vrot.slane %v5395_v35, %v6067_v44  ;;  %v5623_v21 = vpop.f32.mrf.mxu1 }
 0x4f1   :  { %5096 = vrot.lane.b32.xlu0 %v4944_v18, %s5866_s27 }
 0x4f2   :  { %v4246_v6 = vpop.f32.mrf.mxu1  ;;  %v4894_v50 = vcombine.low %v4829_v61, %v4845_v47  ;;  %v4926_v8 = vcombine.low %v4861_v60, %v4877_v20  ;;  %v4895_v34 = vcombine.high %v4829_v61, %v4845_v47  ;;  %v4927_v16 = vcombine.high %v4861_v60, %v4877_v20 }
 0x4f3   :  { %v4694_v59 = vcombine.low %v4100_v58, %v4246_v6  ;;  %v4695_v1 = vcombine.high %v4100_v58, %v4246_v6 }
 0x4f4   :  { %v5633_v46 = vpop.f32.mrf.mxu1  ;;  %v4902_v27 = vrot.slane %v4894_v50, %v6075_v56  ;;  %v4934_v26 = vrot.slane %v4926_v8, %v6075_v56  ;;  %v4909_v0 = vrot.slane %v4895_v34, %v6075_v56  ;;  %v4941_v14 = vrot.slane %v4927_v16, %v6075_v56 }
 0x4f5   :  { %v4702_v23 = vrot.slane %v4694_v59, %v6067_v44  ;;  %v4709_v54 = vrot.slane %v4695_v1, %v6067_v44  ;;  %5104 = vrot.lane.b32.xlu0 %v4945_v52, %s5882_s22 }
 0x4f6   :  { %v4946_v3 = vcombine.low %v4902_v27, %v4934_v26  ;;  %v4947_v37 = vcombine.high %v4902_v27, %v4934_v26  ;;  %v4948_v30 = vcombine.low %v4909_v0, %v4941_v14  ;;  %v4949_v50 = vcombine.high %v4909_v0, %v4941_v14  ;;  %v5164_v14 = vld [vmem:[#allocation7 + $0x18] sm:$0xff] }
 0x4f7   :  { %v4742_v40 = vcombine.low %v4686_v53, %v4702_v23  ;;  %v4743_v48 = vcombine.high %v4686_v53, %v4702_v23  ;;  %v4758_v42 = vcombine.low %v4693_v15, %v4709_v54  ;;  %v4759_v39 = vcombine.high %v4693_v15, %v4709_v54  ;;  %5654 = vmatprep.subr.mxu0 %v5164_v14 }
 0x4f8   :  { %v4319_v2 = vpop.f32.mrf.mxu0  ;;  %v4392_v31 = vpop.f32.mrf.mxu1  ;;  %5655 = vmatpush3.msra.mxu0 %v5164_v14 }
 0x4f9   :  { %v4750_v25 = vrot.slane %v4742_v40, %v6075_v56  ;;  %v4757_v63 = vrot.slane %v4743_v48, %v6075_v56  ;;  %v4766_v57 = vrot.slane %v4758_v42, %v6075_v56  ;;  %v4773_v9 = vrot.slane %v4759_v39, %v6075_v56  ;;  %5112 = vrot.lane.b32.xlu0 %v4946_v3, %s5883_s23 }
 0x4fa   :  { %v5638_v33 = vpop.f32.mrf.mxu0  ;;  %v5643_v55 = vpop.f32.mrf.mxu1 }
 0x4fb   :  { %v5396_v51 = vcombine.low %v4750_v25, %v4757_v63  ;;  %v5398_v62 = vcombine.high %v4750_v25, %v4757_v63  ;;  %v5400_v5 = vcombine.low %v4766_v57, %v4773_v9  ;;  %v5402_v32 = vcombine.high %v4766_v57, %v4773_v9  ;;  %v5163_v25 = vld [vmem:[#allocation7 + $0x10] sm:$0xff]  ;;  %v5162_v33 = vld [vmem:[#allocation7 + $0x8] sm:$0xff]  ;;  %v5161_v55 = vld [vmem:[#allocation7] sm:$0xff] }
 0x4fc   :  { %v4465_v10 = vpop.f32.mrf.mxu0  ;;  %v4538_v45 = vpop.f32.mrf.mxu1  ;;  %5656 = vmatprep.subr.mxu0 %v5163_v25 }
 0x4fd   :  { %5120 = vrot.lane.b32.xlu0 %v4947_v37, %s5884_s24  ;;  %v4710_v7 = vcombine.low %v4319_v2, %v4465_v10  ;;  %v4711_v24 = vcombine.high %v4319_v2, %v4465_v10  ;;  %v4726_v13 = vcombine.low %v4392_v31, %v4538_v45  ;;  %v4727_v41 = vcombine.high %v4392_v31, %v4538_v45 }
 0x4fe   :  { %v5648_v36 = vpop.f32.mrf.mxu0  ;;  %v5653_v43 = vpop.f32.mrf.mxu1  ;;  %v4958_v19 = vrot.slane %v5396_v51, %v6067_v44  ;;  %v4974_v12 = vrot.slane %v5398_v62, %v6067_v44  ;;  %v4990_v22 = vrot.slane %v5400_v5, %v6067_v44  ;;  %v5006_v28 = vrot.slane %v5402_v32, %v6067_v44  ;;  %5657 = vmatpush3.msra.mxu0 %v5163_v25 }
 0x4ff   :  { %v4718_v17 = vrot.slane %v4710_v7, %v6067_v44  ;;  %v4725_v35 = vrot.slane %v4711_v24, %v6067_v44  ;;  %v4734_v58 = vrot.slane %v4726_v13, %v6067_v44  ;;  %v4741_v18 = vrot.slane %v4727_v41, %v6067_v44  ;;  %5658 = vmatprep.subr.mxu0 %v5162_v33 }
 0x500   :  { %v5014_v61 = vcombine.low %v4958_v19, %v4974_v12  ;;  %v5046_v47 = vcombine.low %v4990_v22, %v5006_v28  ;;  %v5015_v60 = vcombine.high %v4958_v19, %v4974_v12  ;;  %v5047_v20 = vcombine.high %v4990_v22, %v5006_v28  ;;  %5659 = vmatpush3.msra.mxu0 %v5162_v33 }
 0x501   :  { %v4774_v21 = vcombine.low %v4718_v17, %v4734_v58  ;;  %v4775_v49 = vcombine.high %v4718_v17, %v4734_v58  ;;  %v4790_v4 = vcombine.low %v4725_v35, %v4741_v18  ;;  %v4791_v6 = vcombine.high %v4725_v35, %v4741_v18  ;;  %5128 = vrot.lane.b32.xlu0 %v4948_v30, %s5885_s25 }
 0x502   :  { %v6936_v8 = vrot.slane %v5014_v61, %v6075_v56  ;;  %v6939_v59 = vrot.slane %v5046_v47, %v6075_v56  ;;  %v5029_v34 = vrot.slane %v5015_v60, %v6075_v56  ;;  %v5061_v16 = vrot.slane %v5047_v20, %v6075_v56  ;;  %5660 = vmatprep.subr.mxu0 %v5161_v55 }
 0x503   :  { %v4782_v1 = vrot.slane %v4774_v21, %v6075_v56  ;;  %v4789_v52 = vrot.slane %v4775_v49, %v6075_v56  ;;  %v4798_v46 = vrot.slane %v4790_v4, %v6075_v56  ;;  %v4805_v27 = vrot.slane %v4791_v6, %v6075_v56  ;;  %5661 = vmatpush3.msra.mxu0 %v5161_v55 }
 0x504   :  { %v5079_v26 = vcombine.high %v6936_v8, %v6939_v59  ;;  %v5078_v53 = vcombine.low %v6936_v8, %v6939_v59  ;;  %v5080_v2 = vcombine.low %v5029_v34, %v5061_v16  ;;  %v5081_v9 = vcombine.high %v5029_v34, %v5061_v16 }
 0x505   :  { %v5397_v15 = vcombine.low %v4782_v1, %v4789_v52  ;;  %v5399_v23 = vcombine.high %v4782_v1, %v4789_v52  ;;  %v5401_v54 = vcombine.low %v4798_v46, %v4805_v27  ;;  %v5403_v3 = vcombine.high %v4798_v46, %v4805_v27  ;;  %5136 = vrot.lane.b32.xlu0 %v4949_v50, %s5886_s28 }
 0x506   :  { %5090 = vrot.lane.b32.xlu1 %v5079_v26, %s5881_s21 }
 0x507   :  { %v4965_v40 = vrot.slane %v5397_v15, %v6067_v44  ;;  %v4981_v48 = vrot.slane %v5399_v23, %v6067_v44  ;;  %v4997_v42 = vrot.slane %v5401_v54, %v6067_v44  ;;  %v5013_v39 = vrot.slane %v5403_v3, %v6067_v44 }
 0x509   :  { %v5030_v31 = vcombine.low %v4965_v40, %v4981_v48  ;;  %v5062_v0 = vcombine.low %v4997_v42, %v5013_v39  ;;  %v5031_v37 = vcombine.high %v4965_v40, %v4981_v48  ;;  %v5063_v51 = vcombine.high %v4997_v42, %v5013_v39 }
 0x50a   :  { %5098 = vrot.lane.b32.xlu1 %v5080_v2, %s5866_s27 }
 0x50b   :  { %v5038_v63 = vrot.slane %v5030_v31, %v6075_v56  ;;  %v5070_v57 = vrot.slane %v5062_v0, %v6075_v56  ;;  %v5045_v5 = vrot.slane %v5031_v37, %v6075_v56  ;;  %v5077_v32 = vrot.slane %v5063_v51, %v6075_v56 }
 0x50d   :  { %v5082_v44 = vcombine.low %v5038_v63, %v5070_v57  ;;  %v5083_v62 = vcombine.high %v5038_v63, %v5070_v57  ;;  %v5084_v10 = vcombine.low %v5045_v5, %v5077_v32  ;;  %v5085_v45 = vcombine.high %v5045_v5, %v5077_v32 }
 0x50e   :  { %5106 = vrot.lane.b32.xlu1 %v5081_v9, %s5882_s22 }
 0x512   :  { %5114 = vrot.lane.b32.xlu1 %v5082_v44, %s5883_s23 }
 0x516   :  { %5122 = vrot.lane.b32.xlu1 %v5083_v62, %s5884_s24 }
 0x51a   :  { %5130 = vrot.lane.b32.xlu1 %v5084_v10, %s5885_s25 }
 0x51e   :  { %5138 = vrot.lane.b32.xlu1 %v5085_v45, %s5886_s28 }
 0x55f   :  { %v5089_v30 = vpop.permute.xlu0 %5088 }
 0x560   :  { %v5142_v36 = vsel %vm1964_vm2, %v4942_v38, %v5089_v30 }
 0x563   :  { %v5097_v7 = vpop.permute.xlu0 %5096 }
 0x564   :  { %v5144_v56 = vsel %vm3181_vm3, %v5142_v36, %v5097_v7 }
 0x567   :  { %v5105_v24 = vpop.permute.xlu0 %5104 }
 0x568   :  { %v5147_v19 = vsel %vm5146_vm4, %v5144_v56, %v5105_v24 }
 0x56b   :  { %v5113_v13 = vpop.permute.xlu0 %5112 }
 0x56c   :  { %v5150_v12 = vsel %vm5149_vm5, %v5147_v19, %v5113_v13 }
 0x56f   :  { %v5121_v41 = vpop.permute.xlu0 %5120 }
 0x570   :  { %v5153_v22 = vsel %vm5152_vm6, %v5150_v12, %v5121_v41 }
 0x573   :  { %v5129_v43 = vpop.permute.xlu0 %5128 }
 0x574   :  { %v5156_v28 = vsel %vm5155_vm7, %v5153_v22, %v5129_v43 }
 0x577   :  { %v5137_v17 = vpop.permute.xlu0 %5136 }
 0x578   :  { %v5091_v35 = vpop.permute.xlu1 %5090  ;;  %v5159_v29 = vsel %vm5158_vm8, %v5156_v28, %v5137_v17 }
 0x579   :  { %5662 = vmatprep.mubr.msk.f32.mxu0 %vm78_vm0, %v5159_v29  ;;  %v5143_v61 = vsel %vm1964_vm2, %v5078_v53, %v5091_v35 }
 0x57c   :  { %v5099_v11 = vpop.permute.xlu1 %5098 }
 0x57d   :  { %v5145_v47 = vsel %vm3181_vm3, %v5143_v61, %v5099_v11 }
 0x580   :  { %v5107_v38 = vpop.permute.xlu1 %5106 }
 0x581   :  { %v5148_v20 = vsel %vm5146_vm4, %v5145_v47, %v5107_v38 }
 0x584   :  { %v5115_v58 = vpop.permute.xlu1 %5114 }
 0x585   :  { %v5151_v21 = vsel %vm5149_vm5, %v5148_v20, %v5115_v58 }
 0x588   :  { %v5123_v18 = vpop.permute.xlu1 %5122 }
 0x589   :  { %v5154_v49 = vsel %vm5152_vm6, %v5151_v21, %v5123_v18 }
 0x58c   :  { %v5131_v60 = vpop.permute.xlu1 %5130 }
 0x58d   :  { %v5157_v4 = vsel %vm5155_vm7, %v5154_v49, %v5131_v60 }
 0x590   :  { %v5139_v6 = vpop.permute.xlu1 %5138 }
 0x591   :  { %v5160_v50 = vsel %vm5158_vm8, %v5157_v4, %v5139_v6 }
 0x592   :  { %5663 = vmatmul.mubr.msk.f32.vlgmr.msra.gmra.mxu0 %vm78_vm0, %v5160_v50 }
 0x593   :  { %5826 = shalt.err (!%p5823_p5)
}
 0x594   :  { %5278 = dma.vmem_to_hbm [thread:$0]  %s5273_s30, 2048, %s7012_s6, [#allocation10], %s5865_s26, %s5865_s26, %s5866_s27  }
 0x595   :  { %v5404_v8 = vld [vmem:[%s7010_s4] ss:$0 sm:$0xff]  ;;  %s5888_s1 = smov [#allocation8]  }
 0x596   :  { %s5260_s12 = sshll.u32 %s5888_s1, 4  ;;  %s5261_s12 = int_to_ptr.vmem [resolvable:$true] %s5260_s12 }
 0x597   :  { %s5835_s0 = scalar_lea.vmem %s5261_s12, 256  ;;  %p5840_p7 = scmp.lt.s32.totalorder %s5261_s12, %s5261_s12 }
 0x598   :  { %p5836_p6 = scmp.ne.s32.totalorder %s5261_s12, %s5835_s0  ;;  %p5841_p8 = scmp.lt.s32.totalorder %s5835_s0, %s5835_s0 }
 0x59a   :  { %p5842_p9 = por %p5841_p8, %p5840_p7 }
 0x59c   :  { %p5843_p10 = pnand %p5842_p9, %p5836_p6 }
 0x652   :  { %v5664_v59 = vpop.f32.mrf.mxu0 }
 0x653   :  { %v5250_v1 = vadd.f32 %v5664_v59, %v5404_v8 }
 0x654   :  { %v5244_v52 = vpop.f32.mrf.mxu0 }
 0x655   :  { %5254 = vst.msk [vmem:[#allocation8 + $0x8] sm:$0xff] %vm78_vm0, %v5250_v1  ;;  %v5245_v46 = vadd.f32 %v5404_v8, %v5244_v52 }
 0x657   :  { %5253 = vst.msk [vmem:[#allocation8] sm:$0xff] %vm78_vm0, %v5245_v46 }
 0x658   :  { %5846 = shalt.err (!%p5843_p10)
}
 0x659   :  { %5266 = dma.vmem_to_hbm [thread:$0]  %s5261_s12, 256, %s7011_s5, [#allocation4], %s5865_s26, %s5865_s26, %s5866_s27  }
 0x65a   :  { %5859 = dma.done.wait [#allocation4], 256  }
 0x65b   :  { %5860 = vsyncadd [#allocation4], 4294967040 }
 0x65c   :  { %5861 = dma.done.wait [#allocation10], 2048  }
 0x65d   :  { %5862 = vsyncadd [#allocation10], 4294965248 }
 0x65e   :  { %5285 = vsyncpa [#allocation3], 1 }
 0x65f   :  { %5286 = vsyncpa [#allocation6], 1 }
 0x660   :  { %5287 = vsyncpa [#allocation4], 1 }
 0x661   :  { %5288 = vsyncpa [#allocation10], 1 }

</bundles_post_ra>
